<compile_context>
chip_gen: v7x
topology: tpu7x:2x2x1
jax: 0.10.0
libtpu: 0.0.40
codegen_flags: <defaults>
</compile_context>

<pallas_src>
import functools
import math

import jax
import jax.numpy as jnp
from jax.experimental import pallas as pl
from jax.experimental.pallas import tpu as pltpu

LN_EPS = 1e-5          # PyTorch nn.LayerNorm default
CLS_PAD = 128          # classifier logits padded to a full lane width
NEG_BIG = -1e30        # bias for padded classes -> exp() == 0 after max-shift

STACKED_PARAMS = [
    "wq", "bq", "wk", "bk", "wv", "bv", "wo", "bo",
    "ln1g", "ln1b", "w1", "b1", "w2", "b2", "ln2g", "ln2b",
]
BF16_WEIGHTS = ("wq", "wk", "wv", "wo", "w1", "w2")


# ---------------------------------------------------------------------------
# Fused Pallas kernel: all encoder layers + classifier
# ---------------------------------------------------------------------------
def _layer_norm(y, g, b):
    # Two-pass variance mean((y-mu)^2): avoids the catastrophic-cancellation
    # negative-variance / NaN risk of mean(y*y) - mu*mu at eps=1e-5.
    mu = jnp.mean(y, axis=-1, keepdims=True)
    yc = y - mu
    var = jnp.mean(yc * yc, axis=-1, keepdims=True)
    return yc * jax.lax.rsqrt(var + LN_EPS) * g + b


def fused_encoder_kernel(x_ref, wq_ref, bq_ref, wk_ref, bk_ref, wv_ref, bv_ref,
                         wo_ref, bo_ref, ln1g_ref, ln1b_ref,
                         w1_ref, b1_ref, w2_ref, b2_ref, ln2g_ref, ln2b_ref,
                         clsw_ref, clsb_ref,
                         probs_ref,
                         act_ref,
                         *, b_tile, seq, emb, head, q_k_size, v_size, nlayers):
    layer = pl.program_id(1)
    S, E, H, DQK, DV = seq, emb, head, q_k_size, v_size
    M = b_tile * S                                     # flattened MXU M dim

    # Layer 0: load the embedded batch slab into the VMEM-resident activation
    # scratch; it stays resident across the (inner) layer axis.
    @pl.when(layer == 0)
    def _():
        act_ref[...] = x_ref[...].reshape(M, E)

    x2 = act_ref[...]                                  # (M, E) f32
    xb = x2.astype(jnp.bfloat16)                       # one bf16 cast reused by Q/K/V

    # --- QKV projections: 2-D bf16 matmuls (M = B_tile*S), f32 accumulation ---
    q = jnp.dot(xb, wq_ref[...], preferred_element_type=jnp.float32) + bq_ref[...]
    k = jnp.dot(xb, wk_ref[...], preferred_element_type=jnp.float32) + bk_ref[...]
    v = jnp.dot(xb, wv_ref[...], preferred_element_type=jnp.float32) + bv_ref[...]
    q = q * (1.0 / math.sqrt(DQK))     # pre-scale q once instead of scaling (S,S) scores

    # head split -> single merged (B_tile*H) batch dim for the attention matmuls
    # (reshape only on f32 8-row tiles; bf16 cast afterwards).
    # TODO(synk): with q_k_size / v_size multiples of 128 these head slices are
    #             vreg-aligned and the stack is a relabel, not a relayout.
    q3 = q.reshape(b_tile, S, H * DQK).astype(jnp.bfloat16)
    k3 = k.reshape(b_tile, S, H * DQK).astype(jnp.bfloat16)
    v3 = v.reshape(b_tile, S, H * DV).astype(jnp.bfloat16)
    qg = jnp.stack([q3[:, :, h * DQK:(h + 1) * DQK] for h in range(H)],
                   axis=1).reshape(b_tile * H, S, DQK)             # (G, S, QK)
    kg = jnp.stack([k3[:, :, h * DQK:(h + 1) * DQK] for h in range(H)],
                   axis=1).reshape(b_tile * H, S, DQK)
    vg = jnp.stack([v3[:, :, h * DV:(h + 1) * DV] for h in range(H)],
                   axis=1).reshape(b_tile * H, S, DV)

    # --- attention: one batched scores matmul + one batched PV matmul ---
    scores = jnp.einsum('gqd,gkd->gqk', qg, kg,
                        preferred_element_type=jnp.float32)        # (G, S, S) f32
    scores = scores - jnp.max(scores, axis=-1, keepdims=True)
    p = jnp.exp(scores)             # TODO(synk): bf16 exp on v6e/v7x (EUP 2x)
    denom = jnp.sum(p, axis=-1, keepdims=True)                     # (G, S, 1)
    zg = jnp.einsum('gqk,gkv->gqv', p.astype(jnp.bfloat16), vg,
                    preferred_element_type=jnp.float32)            # (G, S, V)
    # deferred softmax normalization: scale the (G,S,V) output, not (G,S,S)
    zg = zg * pl.reciprocal(denom, approx=True)

    # head concat in registers -> single Wo matmul (no masked partial stores)
    z4 = zg.reshape(b_tile, H, S, DV)
    zcat = jnp.concatenate([z4[:, h] for h in range(H)], axis=-1)  # (Bt, S, H*V)
    z2 = zcat.reshape(M, H * DV).astype(jnp.bfloat16)
    z = jnp.dot(z2, wo_ref[...], preferred_element_type=jnp.float32) + bo_ref[...]

    # add & norm 1
    h1 = _layer_norm(z + x2, ln1g_ref[...], ln1b_ref[...])

    # feed-forward: Linear -> ReLU -> Linear (bf16 operands, f32 accumulation)
    ff = jnp.dot(h1.astype(jnp.bfloat16), w1_ref[...],
                 preferred_element_type=jnp.float32) + b1_ref[...]
    ff = jnp.maximum(ff, 0.0)
    ff = jnp.dot(ff.astype(jnp.bfloat16), w2_ref[...],
                 preferred_element_type=jnp.float32) + b2_ref[...]

    # add & norm 2 -> activations stay resident for the next layer step
    out2 = _layer_norm(ff + h1, ln2g_ref[...], ln2b_ref[...])      # (M, E)
    act_ref[...] = out2

    # fused classifier, batched over the B_tile class tokens, on the last layer
    @pl.when(layer == nlayers - 1)
    def _():
        out3 = out2.reshape(b_tile, S, E)
        cls_tok = out3[:, 0, :].astype(jnp.bfloat16)               # (Bt, E)
        logits = jnp.dot(cls_tok, clsw_ref[...],
                         preferred_element_type=jnp.float32) + clsb_ref[...]
        logits = logits - jnp.max(logits, axis=-1, keepdims=True)  # pads -> -1e30
        pc = jnp.exp(logits)                                       # pads -> 0
        # exact divide for the final output so probabilities sum to 1
        probs_ref[...] = pc / jnp.sum(pc, axis=-1, keepdims=True)


# ---------------------------------------------------------------------------
# Wrapper
# ---------------------------------------------------------------------------
def _padded_block_bytes(shape, dtype):
    """Approximate VMEM footprint of a block, padded to (sublane, 128) tiles."""
    shape = tuple(int(d) for d in shape)
    if len(shape) < 2:
        shape = (1,) * (2 - len(shape)) + shape
    itemsize = jnp.dtype(dtype).itemsize
    sub = max(8, 32 // itemsize)
    rows = -(-shape[-2] // sub) * sub
    cols = -(-shape[-1] // 128) * 128
    lead = 1
    for d in shape[:-2]:
        lead *= d
    return lead * rows * cols * itemsize


def _physical_vmem_bytes():
    try:
        cap = getattr(pltpu.get_tpu_info(), "vmem_capacity_bytes", None)
        if cap:
            return int(cap)
    except Exception:
        pass
    return 64 << 20   # conservative default (v7x per-TC VMEM)


def _pick_b_tile(batch, max_tile=8):
    # Largest divisor of batch <= max_tile.  On v7x prefer an even number of
    # batch blocks so both TensorCores get work.
    t = max(1, min(batch, max_tile))
    while batch % t:
        t -= 1
    return t


def text_encoder_pallas(x, params, head, q_k_size, v_size, b_tile=None):
    B, S, E = x.shape
    stacked = [params[name] for name in STACKED_PARAMS]
    L = stacked[0].shape[0]
    cls_w, cls_b = params["cls_w"], params["cls_b"]
    cpad = cls_w.shape[1]
    if b_tile is None:
        b_tile = _pick_b_tile(B)
    assert B % b_tile == 0

    in_specs = [pl.BlockSpec((b_tile, S, E), lambda bb, l: (bb, 0, 0))]
    for a in stacked:
        # layer-stacked weight: squeeze the layer dim, index it with the layer axis
        in_specs.append(pl.BlockSpec((None,) + a.shape[1:], lambda bb, l: (l, 0, 0)))
    in_specs.append(pl.BlockSpec(cls_w.shape, lambda bb, l: (0, 0)))
    in_specs.append(pl.BlockSpec(cls_b.shape, lambda bb, l: (0, 0)))
    out_spec = pl.BlockSpec((b_tile, cpad), lambda bb, l: (bb, 0))

    scratch_shapes = [pltpu.VMEM((b_tile * S, E), jnp.float32)]    # resident activations

    # --- explicit VMEM budget: double-buffered blocks + scratch + temporaries ---
    M, G = b_tile * S, b_tile * head
    hq, hv, F = head * q_k_size, head * v_size, params["w1"].shape[-1]
    vmem = sum(2 * _padded_block_bytes(a.shape[1:], a.dtype) for a in stacked)
    vmem += 2 * _padded_block_bytes((b_tile, S, E), x.dtype)
    vmem += 2 * _padded_block_bytes(cls_w.shape, cls_w.dtype)
    vmem += 2 * _padded_block_bytes(cls_b.shape, cls_b.dtype)
    vmem += 2 * _padded_block_bytes((b_tile, cpad), jnp.float32)
    vmem += _padded_block_bytes((M, E), jnp.float32)               # act scratch
    # in-kernel temporaries (compiler-managed)
    tmp = 0
    tmp += _padded_block_bytes((M, E), jnp.float32) * 4            # x2, z, h1, out
    tmp += _padded_block_bytes((M, E), jnp.bfloat16) * 2           # xb, h1 bf16
    tmp += _padded_block_bytes((M, hq), jnp.float32) * 2           # q, k
    tmp += _padded_block_bytes((M, hq), jnp.bfloat16) * 4          # q/k bf16 (+head stacks)
    tmp += _padded_block_bytes((M, hv), jnp.float32) * 2           # v, zcat
    tmp += _padded_block_bytes((M, hv), jnp.bfloat16) * 3          # v bf16, stack, z2
    tmp += _padded_block_bytes((G, S, S), jnp.float32)             # scores
    tmp += _padded_block_bytes((G, S, S), jnp.bfloat16)            # p bf16
    tmp += _padded_block_bytes((G, S, v_size), jnp.float32)        # zg
    tmp += _padded_block_bytes((M, F), jnp.float32)                # ffn act
    tmp += _padded_block_bytes((M, F), jnp.bfloat16)
    vmem += tmp
    phys = _physical_vmem_bytes()
    vmem_limit = int(min(max(vmem + vmem // 4 + (2 << 20), 4 << 20), (phys * 3) // 4))

    kern = functools.partial(fused_encoder_kernel, b_tile=b_tile, seq=S, emb=E,
                             head=head, q_k_size=q_k_size, v_size=v_size,
                             nlayers=L)
    return pl.pallas_call(
        kern,
        out_shape=jax.ShapeDtypeStruct((B, cpad), jnp.float32),
        grid=(B // b_tile, L),
        in_specs=in_specs,
        out_specs=out_spec,
        scratch_shapes=scratch_shapes,
        compiler_params=pltpu.CompilerParams(
            dimension_semantics=("parallel", "arbitrary"),
            vmem_limit_bytes=vmem_limit),
    )(x, *stacked, cls_w, cls_b)


# ---------------------------------------------------------------------------
# Glue: params, embedding, positional encoding, forward
# ---------------------------------------------------------------------------
def sinusoidal_pos_encoding(seq_max_len, emb):
    pos = jnp.arange(seq_max_len, dtype=jnp.float32)[:, None]
    div = jnp.exp(-jnp.arange(0, emb, 2, dtype=jnp.float32)
                  * (math.log(10000.0) / emb))
    ang = pos * div
    pe = jnp.zeros((seq_max_len, emb), jnp.float32)
    pe = pe.at[:, 0::2].set(jnp.sin(ang))
    pe = pe.at[:, 1::2].set(jnp.cos(ang))
    return pe


def _linear_init(key, fan_in, shape):
    bound = 1.0 / math.sqrt(fan_in)
    return jax.random.uniform(key, shape, jnp.float32, -bound, bound)


def init_params(key, vocab, E, QK, V, F, H, nblocks, C):
    keys = jax.random.split(key, 4 + nblocks)
    cls_w = _linear_init(keys[2], E, (E, C))
    cls_b = _linear_init(keys[3], E, (1, C))
    cls_w_pad = jnp.zeros((E, CLS_PAD), jnp.float32).at[:, :C].set(cls_w)
    cls_b_pad = jnp.full((1, CLS_PAD), NEG_BIG, jnp.float32).at[:, :C].set(cls_b)

    blocks = []
    for i in range(nblocks):
        bk = jax.random.split(keys[4 + i], 12)
        blocks.append({
            "wq": _linear_init(bk[0], E, (E, H * QK)),
            "bq": _linear_init(bk[1], E, (1, H * QK)),
            "wk": _linear_init(bk[2], E, (E, H * QK)),
            "bk": _linear_init(bk[3], E, (1, H * QK)),
            "wv": _linear_init(bk[4], E, (E, H * V)),
            "bv": _linear_init(bk[5], E, (1, H * V)),
            "wo": _linear_init(bk[6], H * V, (H * V, E)),
            "bo": _linear_init(bk[7], H * V, (1, E)),
            "ln1g": jnp.ones((1, E), jnp.float32),
            "ln1b": jnp.zeros((1, E), jnp.float32),
            "w1": _linear_init(bk[8], E, (E, F)),
            "b1": _linear_init(bk[9], E, (1, F)),
            "w2": _linear_init(bk[10], F, (F, E)),
            "b2": _linear_init(bk[11], F, (1, E)),
            "ln2g": jnp.ones((1, E), jnp.float32),
            "ln2b": jnp.zeros((1, E), jnp.float32),
        })
    stacked = {k: jnp.stack([b[k] for b in blocks], axis=0) for k in STACKED_PARAMS}
    for k in BF16_WEIGHTS:
        stacked[k] = stacked[k].astype(jnp.bfloat16)     # bf16 MXU operands

    params = {
        "class_head": jax.random.uniform(keys[0], (1, 1, E), jnp.float32),
        "emb": jax.random.normal(keys[1], (vocab, E), jnp.float32),
        "cls_w": cls_w_pad.astype(jnp.bfloat16),
        "cls_b": cls_b_pad,                              # f32: keeps the -1e30 sentinel safe
    }
    params.update(stacked)
    return params


def text_encoder_forward(tokens, params, pos_enc, head, q_k_size, v_size, class_num):
    B, S = tokens.shape
    E = params["emb"].shape[1]
    # EmbeddingwithPosition (gather + sinusoidal PE; dropout = identity in eval)
    x = params["emb"][tokens] + pos_enc[:S][None, :, :]          # (B, S, E)
    cls = jnp.broadcast_to(params["class_head"], (B, 1, E))
    x = jnp.concatenate([cls, x], axis=1)                        # (B, S+1, E)
    probs_pad = text_encoder_pallas(x, params, head, q_k_size, v_size)
    return probs_pad[:, :class_num]                              # drop padded classes


# ---------------------------------------------------------------------------
# Pure-JAX f32 reference (for correctness check)
# ---------------------------------------------------------------------------
def _ref_block_single(x, blk, head, q_k_size, v_size):
    f32 = lambda a: a.astype(jnp.float32)
    q = x @ f32(blk["wq"]) + blk["bq"]
    k = x @ f32(blk["wk"]) + blk["bk"]
    v = x @ f32(blk["wv"]) + blk["bv"]
    scale = 1.0 / math.sqrt(q_k_size)
    zs = []
    for h in range(head):
        qh = q[:, h * q_k_size:(h + 1) * q_k_size]
        kh = k[:, h * q_k_size:(h + 1) * q_k_size]
        vh = v[:, h * v_size:(h + 1) * v_size]
        attn = jax.nn.softmax(qh @ kh.T * scale, axis=-1)
        zs.append(attn @ vh)
    z = jnp.concatenate(zs, axis=-1) @ f32(blk["wo"]) + blk["bo"]

    def ln(y, g, b):
        mu = jnp.mean(y, axis=-1, keepdims=True)
        var = jnp.mean((y - mu) ** 2, axis=-1, keepdims=True)
        return (y - mu) * jax.lax.rsqrt(var + LN_EPS) * g + b

    h1 = ln(z + x, blk["ln1g"], blk["ln1b"])
    ff = jnp.maximum(h1 @ f32(blk["w1"]) + blk["b1"], 0.0) @ f32(blk["w2"]) + blk["b2"]
    return ln(ff + h1, blk["ln2g"], blk["ln2b"])


def ref_forward(tokens, params, pos_enc, head, q_k_size, v_size, class_num):
    B, S = tokens.shape
    E = params["emb"].shape[1]
    x = params["emb"][tokens] + pos_enc[:S][None, :, :]
    cls = jnp.broadcast_to(params["class_head"], (B, 1, E))
    x = jnp.concatenate([cls, x], axis=1)
    L = params["wq"].shape[0]
    for l in range(L):
        blk = {k: params[k][l] for k in STACKED_PARAMS}
        x = jax.vmap(lambda xb, blk=blk: _ref_block_single(
            xb, blk, head, q_k_size, v_size))(x)
    w = params["cls_w"][:, :class_num].astype(jnp.float32)
    b = params["cls_b"][:, :class_num]
    logits = x[:, 0, :] @ w + b
    return jax.nn.softmax(logits, axis=1)


# ---------------------------------------------------------------------------
if __name__ == "__main__":
    vocab, E, QK, V, F, H = 50, 32, 16, 16, 64, 2
    nblocks, C = 2, 4
    # seq=7 tokens + class token -> S=8 (a sublane multiple, so in-kernel
    # (B_tile*S, E) flattens are clean retilings).
    B, seq = 2, 7
    seq_max_len = 64

    key = jax.random.PRNGKey(0)
    kp, kx = jax.random.split(key)
    params = init_params(kp, vocab, E, QK, V, F, H, nblocks, C)
    pos_enc = sinusoidal_pos_encoding(seq_max_len, E)
    tokens = jax.random.randint(kx, (B, seq), 0, vocab, dtype=jnp.int32)

    out = text_encoder_forward(tokens, params, pos_enc, H, QK, V, C)
    out = jax.block_until_ready(out)
    assert out.shape == (B, C)

    ref = ref_forward(tokens, params, pos_enc, H, QK, V, C)
    # Kernel uses bf16 matmul operands + approx reciprocal inside attention ->
    # compare against the f32 reference with a correspondingly looser tolerance.
    assert bool(jnp.allclose(out, ref, atol=2e-2, rtol=2e-2)), "mismatch vs reference"
    # final softmax uses an exact divide -> rows sum to 1 tightly
    assert bool(jnp.allclose(jnp.sum(out, axis=1), 1.0, atol=1e-3))

    print("KERNEL_OK")
</pallas_src>

<mosaic_0001>
module attributes {stable_mosaic.version = 11 : i64} {
  func.func @fused_encoder_kernel(%arg0: i32, %arg1: i32, %arg2: memref<2x8x32xf32, #tpu.memory_space<vmem>>, %arg3: memref<1x32x32xbf16, #tpu.memory_space<vmem>>, %arg4: memref<1x1x32xf32, #tpu.memory_space<vmem>>, %arg5: memref<1x32x32xbf16, #tpu.memory_space<vmem>>, %arg6: memref<1x1x32xf32, #tpu.memory_space<vmem>>, %arg7: memref<1x32x32xbf16, #tpu.memory_space<vmem>>, %arg8: memref<1x1x32xf32, #tpu.memory_space<vmem>>, %arg9: memref<1x32x32xbf16, #tpu.memory_space<vmem>>, %arg10: memref<1x1x32xf32, #tpu.memory_space<vmem>>, %arg11: memref<1x1x32xf32, #tpu.memory_space<vmem>>, %arg12: memref<1x1x32xf32, #tpu.memory_space<vmem>>, %arg13: memref<1x32x64xbf16, #tpu.memory_space<vmem>>, %arg14: memref<1x1x64xf32, #tpu.memory_space<vmem>>, %arg15: memref<1x64x32xbf16, #tpu.memory_space<vmem>>, %arg16: memref<1x1x32xf32, #tpu.memory_space<vmem>>, %arg17: memref<1x1x32xf32, #tpu.memory_space<vmem>>, %arg18: memref<1x1x32xf32, #tpu.memory_space<vmem>>, %arg19: memref<32x128xbf16, #tpu.memory_space<vmem>>, %arg20: memref<1x128xf32, #tpu.memory_space<vmem>>, %arg21: memref<2x128xf32, #tpu.memory_space<vmem>>, %arg22: memref<16x32xf32, #tpu.memory_space<vmem>>) attributes {dimension_semantics = [#tpu.dimension_semantics<parallel>, #tpu.dimension_semantics<arbitrary>], iteration_bounds = array<i64: 1, 2>, scalar_prefetch = 0 : i64, scratch_operands = 1 : i64, tpu.core_type = #tpu.core_type<tc>, window_params = [{transform_indices = @transform_0, window_bounds = array<i64: 2, 8, 32>}, {transform_indices = @transform_1, window_bounds = array<i64: 1, 32, 32>}, {transform_indices = @transform_2, window_bounds = array<i64: 1, 1, 32>}, {transform_indices = @transform_3, window_bounds = array<i64: 1, 32, 32>}, {transform_indices = @transform_4, window_bounds = array<i64: 1, 1, 32>}, {transform_indices = @transform_5, window_bounds = array<i64: 1, 32, 32>}, {transform_indices = @transform_6, window_bounds = array<i64: 1, 1, 32>}, {transform_indices = @transform_7, window_bounds = array<i64: 1, 32, 32>}, {transform_indices = @transform_8, window_bounds = array<i64: 1, 1, 32>}, {transform_indices = @transform_9, window_bounds = array<i64: 1, 1, 32>}, {transform_indices = @transform_10, window_bounds = array<i64: 1, 1, 32>}, {transform_indices = @transform_11, window_bounds = array<i64: 1, 32, 64>}, {transform_indices = @transform_12, window_bounds = array<i64: 1, 1, 64>}, {transform_indices = @transform_13, window_bounds = array<i64: 1, 64, 32>}, {transform_indices = @transform_14, window_bounds = array<i64: 1, 1, 32>}, {transform_indices = @transform_15, window_bounds = array<i64: 1, 1, 32>}, {transform_indices = @transform_16, window_bounds = array<i64: 1, 1, 32>}, {pipeline_mode = #tpu.pipeline_mode<synchronous>, transform_indices = @transform_17, window_bounds = array<i64: 32, 128>}, {pipeline_mode = #tpu.pipeline_mode<synchronous>, transform_indices = @transform_18, window_bounds = array<i64: 1, 128>}, {transform_indices = @transform_19, window_bounds = array<i64: 2, 128>}]} {
    %c0_i32 = arith.constant 0 : i32
    %0 = arith.cmpi eq, %arg1, %c0_i32 : i32
    %1 = arith.extui %0 : i1 to i32
    %c0_i32_0 = arith.constant 0 : i32
    %2 = arith.cmpi ne, %1, %c0_i32_0 : i32
    scf.if %2 {
      %c0_74 = arith.constant 0 : index
      %c0_75 = arith.constant 0 : index
      %c0_76 = arith.constant 0 : index
      %152 = vector.load %arg2[%c0_74, %c0_75, %c0_76] : memref<2x8x32xf32, #tpu.memory_space<vmem>>, vector<2x8x32xf32>
      %153 = vector.shape_cast %152 : vector<2x8x32xf32> to vector<16x32xf32>
      %c0_77 = arith.constant 0 : index
      %c0_78 = arith.constant 0 : index
      %154 = vector.load %arg22[%c0_77, %c0_78] : memref<16x32xf32, #tpu.memory_space<vmem>>, vector<16x32xf32>
      tpu.vector_store %arg22[%c0_77, %c0_78], %153 {strides = array<i32>} : memref<16x32xf32, #tpu.memory_space<vmem>>, vector<16x32xf32>,
    } else {
    }
    %c0 = arith.constant 0 : index
    %c0_1 = arith.constant 0 : index
    %3 = vector.load %arg22[%c0, %c0_1] : memref<16x32xf32, #tpu.memory_space<vmem>>, vector<16x32xf32>
    %4 = arith.truncf %3 : vector<16x32xf32> to vector<16x32xbf16>
    %c0_2 = arith.constant 0 : index
    %c0_3 = arith.constant 0 : index
    %c0_4 = arith.constant 0 : index
    %5 = vector.load %arg3[%c0_2, %c0_3, %c0_4] : memref<1x32x32xbf16, #tpu.memory_space<vmem>>, vector<1x32x32xbf16>
    %6 = vector.shape_cast %5 : vector<1x32x32xbf16> to vector<32x32xbf16>
    %cst = arith.constant dense<0.000000e+00> : vector<16x32xf32>
    %7 = tpu.matmul %4, %6, %cst {dimension_numbers = #tpu.dot_dimension_numbers<[1], [0], [0], [1], [0, 0, 1, 1], [], []>} : vector<16x32xbf16>, vector<32x32xbf16>, vector<16x32xf32> -> vector<16x32xf32>
    %c0_5 = arith.constant 0 : index
    %c0_6 = arith.constant 0 : index
    %c0_7 = arith.constant 0 : index
    %8 = vector.load %arg4[%c0_5, %c0_6, %c0_7] : memref<1x1x32xf32, #tpu.memory_space<vmem>>, vector<1x1x32xf32>
    %9 = vector.shape_cast %8 : vector<1x1x32xf32> to vector<1x32xf32>
    %10 = vector.broadcast %9 : vector<1x32xf32> to vector<16x32xf32>
    %11 = arith.addf %7, %10 : vector<16x32xf32>
    %c0_8 = arith.constant 0 : index
    %c0_9 = arith.constant 0 : index
    %c0_10 = arith.constant 0 : index
    %12 = vector.load %arg5[%c0_8, %c0_9, %c0_10] : memref<1x32x32xbf16, #tpu.memory_space<vmem>>, vector<1x32x32xbf16>
    %13 = vector.shape_cast %12 : vector<1x32x32xbf16> to vector<32x32xbf16>
    %cst_11 = arith.constant dense<0.000000e+00> : vector<16x32xf32>
    %14 = tpu.matmul %4, %13, %cst_11 {dimension_numbers = #tpu.dot_dimension_numbers<[1], [0], [0], [1], [0, 0, 1, 1], [], []>} : vector<16x32xbf16>, vector<32x32xbf16>, vector<16x32xf32> -> vector<16x32xf32>
    %c0_12 = arith.constant 0 : index
    %c0_13 = arith.constant 0 : index
    %c0_14 = arith.constant 0 : index
    %15 = vector.load %arg6[%c0_12, %c0_13, %c0_14] : memref<1x1x32xf32, #tpu.memory_space<vmem>>, vector<1x1x32xf32>
    %16 = vector.shape_cast %15 : vector<1x1x32xf32> to vector<1x32xf32>
    %17 = vector.broadcast %16 : vector<1x32xf32> to vector<16x32xf32>
    %18 = arith.addf %14, %17 : vector<16x32xf32>
    %c0_15 = arith.constant 0 : index
    %c0_16 = arith.constant 0 : index
    %c0_17 = arith.constant 0 : index
    %19 = vector.load %arg7[%c0_15, %c0_16, %c0_17] : memref<1x32x32xbf16, #tpu.memory_space<vmem>>, vector<1x32x32xbf16>
    %20 = vector.shape_cast %19 : vector<1x32x32xbf16> to vector<32x32xbf16>
    %cst_18 = arith.constant dense<0.000000e+00> : vector<16x32xf32>
    %21 = tpu.matmul %4, %20, %cst_18 {dimension_numbers = #tpu.dot_dimension_numbers<[1], [0], [0], [1], [0, 0, 1, 1], [], []>} : vector<16x32xbf16>, vector<32x32xbf16>, vector<16x32xf32> -> vector<16x32xf32>
    %c0_19 = arith.constant 0 : index
    %c0_20 = arith.constant 0 : index
    %c0_21 = arith.constant 0 : index
    %22 = vector.load %arg8[%c0_19, %c0_20, %c0_21] : memref<1x1x32xf32, #tpu.memory_space<vmem>>, vector<1x1x32xf32>
    %23 = vector.shape_cast %22 : vector<1x1x32xf32> to vector<1x32xf32>
    %24 = vector.broadcast %23 : vector<1x32xf32> to vector<16x32xf32>
    %25 = arith.addf %21, %24 : vector<16x32xf32>
    %cst_22 = arith.constant 2.500000e-01 : f32
    %26 = vector.broadcast %cst_22 : f32 to vector<16x32xf32>
    %27 = arith.mulf %11, %26 : vector<16x32xf32>
    %28 = vector.shape_cast %27 : vector<16x32xf32> to vector<2x8x32xf32>
    %29 = arith.truncf %28 : vector<2x8x32xf32> to vector<2x8x32xbf16>
    %30 = vector.shape_cast %18 : vector<16x32xf32> to vector<2x8x32xf32>
    %31 = arith.truncf %30 : vector<2x8x32xf32> to vector<2x8x32xbf16>
    %32 = vector.shape_cast %25 : vector<16x32xf32> to vector<2x8x32xf32>
    %33 = arith.truncf %32 : vector<2x8x32xf32> to vector<2x8x32xbf16>
    %34 = vector.extract_strided_slice %29 {offsets = [0, 0, 0], sizes = [2, 8, 16], strides = [1, 1, 1]} : vector<2x8x32xbf16> to vector<2x8x16xbf16>
    %35 = vector.extract_strided_slice %29 {offsets = [0, 0, 16], sizes = [2, 8, 16], strides = [1, 1, 1]} : vector<2x8x32xbf16> to vector<2x8x16xbf16>
    %36 = vector.shape_cast %34 : vector<2x8x16xbf16> to vector<2x1x8x16xbf16>
    %37 = vector.shape_cast %35 : vector<2x8x16xbf16> to vector<2x1x8x16xbf16>
    %38 = tpu.concatenate %36, %37 in 1 : vector<2x1x8x16xbf16>, vector<2x1x8x16xbf16> -> vector<2x2x8x16xbf16>
    %39 = vector.shape_cast %38 : vector<2x2x8x16xbf16> to vector<4x8x16xbf16>
    %40 = vector.extract_strided_slice %31 {offsets = [0, 0, 0], sizes = [2, 8, 16], strides = [1, 1, 1]} : vector<2x8x32xbf16> to vector<2x8x16xbf16>
    %41 = vector.extract_strided_slice %31 {offsets = [0, 0, 16], sizes = [2, 8, 16], strides = [1, 1, 1]} : vector<2x8x32xbf16> to vector<2x8x16xbf16>
    %42 = vector.shape_cast %40 : vector<2x8x16xbf16> to vector<2x1x8x16xbf16>
    %43 = vector.shape_cast %41 : vector<2x8x16xbf16> to vector<2x1x8x16xbf16>
    %44 = tpu.concatenate %42, %43 in 1 : vector<2x1x8x16xbf16>, vector<2x1x8x16xbf16> -> vector<2x2x8x16xbf16>
    %45 = vector.shape_cast %44 : vector<2x2x8x16xbf16> to vector<4x8x16xbf16>
    %46 = vector.extract_strided_slice %33 {offsets = [0, 0, 0], sizes = [2, 8, 16], strides = [1, 1, 1]} : vector<2x8x32xbf16> to vector<2x8x16xbf16>
    %47 = vector.extract_strided_slice %33 {offsets = [0, 0, 16], sizes = [2, 8, 16], strides = [1, 1, 1]} : vector<2x8x32xbf16> to vector<2x8x16xbf16>
    %48 = vector.shape_cast %46 : vector<2x8x16xbf16> to vector<2x1x8x16xbf16>
    %49 = vector.shape_cast %47 : vector<2x8x16xbf16> to vector<2x1x8x16xbf16>
    %50 = tpu.concatenate %48, %49 in 1 : vector<2x1x8x16xbf16>, vector<2x1x8x16xbf16> -> vector<2x2x8x16xbf16>
    %51 = vector.shape_cast %50 : vector<2x2x8x16xbf16> to vector<4x8x16xbf16>
    "tpu.trace_start"() <{level = 10 : i32, message = "gqd,gkd->gqk"}> : () -> ()
    %cst_23 = arith.constant dense<0.000000e+00> : vector<4x8x8xf32>
    %52 = tpu.matmul %39, %45, %cst_23 {dimension_numbers = #tpu.dot_dimension_numbers<[2], [2], [1], [1], [0, 0, 0, 1, 1, 1], [0], [0]>} : vector<4x8x16xbf16>, vector<4x8x16xbf16>, vector<4x8x8xf32> -> vector<4x8x8xf32>
    "tpu.trace_stop"() : () -> ()
    %cst_24 = arith.constant dense<0xFF800000> : vector<4x8xf32>
    %53 = vector.multi_reduction <maximumf>, %52, %cst_24 [2] : vector<4x8x8xf32> to vector<4x8xf32>
    %54 = vector.shape_cast %53 : vector<4x8xf32> to vector<4x8x1xf32>
    %55 = vector.broadcast %54 : vector<4x8x1xf32> to vector<4x8x8xf32>
    %56 = arith.subf %52, %55 : vector<4x8x8xf32>
    %57 = math.exp %56 : vector<4x8x8xf32>
    %cst_25 = arith.constant dense<0.000000e+00> : vector<4x8xf32>
    %58 = vector.multi_reduction <add>, %57, %cst_25 [2] : vector<4x8x8xf32> to vector<4x8xf32>
    %59 = vector.shape_cast %58 : vector<4x8xf32> to vector<4x8x1xf32>
    %60 = arith.truncf %57 : vector<4x8x8xf32> to vector<4x8x8xbf16>
    "tpu.trace_start"() <{level = 10 : i32, message = "gqk,gkv->gqv"}> : () -> ()
    %cst_26 = arith.constant dense<0.000000e+00> : vector<4x8x16xf32>
    %61 = tpu.matmul %60, %51, %cst_26 {dimension_numbers = #tpu.dot_dimension_numbers<[2], [1], [1], [2], [0, 0, 0, 1, 1, 2], [0], [0]>} : vector<4x8x8xbf16>, vector<4x8x16xbf16>, vector<4x8x16xf32> -> vector<4x8x16xf32>
    "tpu.trace_stop"() : () -> ()
    %62 = tpu.reciprocal %59 {approx = true} : vector<4x8x1xf32> -> vector<4x8x1xf32>
    %63 = vector.broadcast %62 : vector<4x8x1xf32> to vector<4x8x16xf32>
    %64 = arith.mulf %61, %63 : vector<4x8x16xf32>
    %65 = vector.shape_cast %64 : vector<4x8x16xf32> to vector<2x2x8x16xf32>
    %66 = vector.extract_strided_slice %65 {offsets = [0, 0, 0, 0], sizes = [2, 1, 8, 16], strides = [1, 1, 1, 1]} : vector<2x2x8x16xf32> to vector<2x1x8x16xf32>
    %67 = vector.shape_cast %66 : vector<2x1x8x16xf32> to vector<2x8x16xf32>
    %68 = vector.extract_strided_slice %65 {offsets = [0, 1, 0, 0], sizes = [2, 1, 8, 16], strides = [1, 1, 1, 1]} : vector<2x2x8x16xf32> to vector<2x1x8x16xf32>
    %69 = vector.shape_cast %68 : vector<2x1x8x16xf32> to vector<2x8x16xf32>
    %70 = tpu.concatenate %67, %69 in 2 : vector<2x8x16xf32>, vector<2x8x16xf32> -> vector<2x8x32xf32>
    %71 = vector.shape_cast %70 : vector<2x8x32xf32> to vector<16x32xf32>
    %72 = arith.truncf %71 : vector<16x32xf32> to vector<16x32xbf16>
    %c0_27 = arith.constant 0 : index
    %c0_28 = arith.constant 0 : index
    %c0_29 = arith.constant 0 : index
    %73 = vector.load %arg9[%c0_27, %c0_28, %c0_29] : memref<1x32x32xbf16, #tpu.memory_space<vmem>>, vector<1x32x32xbf16>
    %74 = vector.shape_cast %73 : vector<1x32x32xbf16> to vector<32x32xbf16>
    %cst_30 = arith.constant dense<0.000000e+00> : vector<16x32xf32>
    %75 = tpu.matmul %72, %74, %cst_30 {dimension_numbers = #tpu.dot_dimension_numbers<[1], [0], [0], [1], [0, 0, 1, 1], [], []>} : vector<16x32xbf16>, vector<32x32xbf16>, vector<16x32xf32> -> vector<16x32xf32>
    %c0_31 = arith.constant 0 : index
    %c0_32 = arith.constant 0 : index
    %c0_33 = arith.constant 0 : index
    %76 = vector.load %arg10[%c0_31, %c0_32, %c0_33] : memref<1x1x32xf32, #tpu.memory_space<vmem>>, vector<1x1x32xf32>
    %77 = vector.shape_cast %76 : vector<1x1x32xf32> to vector<1x32xf32>
    %78 = vector.broadcast %77 : vector<1x32xf32> to vector<16x32xf32>
    %79 = arith.addf %75, %78 : vector<16x32xf32>
    %80 = arith.addf %79, %3 : vector<16x32xf32>
    %c0_34 = arith.constant 0 : index
    %c0_35 = arith.constant 0 : index
    %c0_36 = arith.constant 0 : index
    %81 = vector.load %arg11[%c0_34, %c0_35, %c0_36] : memref<1x1x32xf32, #tpu.memory_space<vmem>>, vector<1x1x32xf32>
    %82 = vector.shape_cast %81 : vector<1x1x32xf32> to vector<1x32xf32>
    %c0_37 = arith.constant 0 : index
    %c0_38 = arith.constant 0 : index
    %c0_39 = arith.constant 0 : index
    %83 = vector.load %arg12[%c0_37, %c0_38, %c0_39] : memref<1x1x32xf32, #tpu.memory_space<vmem>>, vector<1x1x32xf32>
    %84 = vector.shape_cast %83 : vector<1x1x32xf32> to vector<1x32xf32>
    %cst_40 = arith.constant dense<0.000000e+00> : vector<16xf32>
    %85 = vector.multi_reduction <add>, %80, %cst_40 [1] : vector<16x32xf32> to vector<16xf32>
    %86 = vector.shape_cast %85 : vector<16xf32> to vector<16x1xf32>
    %cst_41 = arith.constant 3.200000e+01 : f32
    %87 = vector.broadcast %cst_41 : f32 to vector<16x1xf32>
    %88 = arith.divf %86, %87 : vector<16x1xf32>
    %89 = vector.broadcast %88 : vector<16x1xf32> to vector<16x32xf32>
    %90 = arith.subf %80, %89 : vector<16x32xf32>
    %91 = arith.mulf %90, %90 : vector<16x32xf32>
    %cst_42 = arith.constant dense<0.000000e+00> : vector<16xf32>
    %92 = vector.multi_reduction <add>, %91, %cst_42 [1] : vector<16x32xf32> to vector<16xf32>
    %93 = vector.shape_cast %92 : vector<16xf32> to vector<16x1xf32>
    %cst_43 = arith.constant 3.200000e+01 : f32
    %94 = vector.broadcast %cst_43 : f32 to vector<16x1xf32>
    %95 = arith.divf %93, %94 : vector<16x1xf32>
    %cst_44 = arith.constant 9.99999974E-6 : f32
    %96 = vector.broadcast %cst_44 : f32 to vector<16x1xf32>
    %97 = arith.addf %95, %96 : vector<16x1xf32>
    %98 = math.rsqrt %97 : vector<16x1xf32>
    %99 = vector.broadcast %98 : vector<16x1xf32> to vector<16x32xf32>
    %100 = arith.mulf %90, %99 : vector<16x32xf32>
    %101 = vector.broadcast %82 : vector<1x32xf32> to vector<16x32xf32>
    %102 = arith.mulf %100, %101 : vector<16x32xf32>
    %103 = vector.broadcast %84 : vector<1x32xf32> to vector<16x32xf32>
    %104 = arith.addf %102, %103 : vector<16x32xf32>
    %105 = arith.truncf %104 : vector<16x32xf32> to vector<16x32xbf16>
    %c0_45 = arith.constant 0 : index
    %c0_46 = arith.constant 0 : index
    %c0_47 = arith.constant 0 : index
    %106 = vector.load %arg13[%c0_45, %c0_46, %c0_47] : memref<1x32x64xbf16, #tpu.memory_space<vmem>>, vector<1x32x64xbf16>
    %107 = vector.shape_cast %106 : vector<1x32x64xbf16> to vector<32x64xbf16>
    %cst_48 = arith.constant dense<0.000000e+00> : vector<16x64xf32>
    %108 = tpu.matmul %105, %107, %cst_48 {dimension_numbers = #tpu.dot_dimension_numbers<[1], [0], [0], [1], [0, 0, 1, 1], [], []>} : vector<16x32xbf16>, vector<32x64xbf16>, vector<16x64xf32> -> vector<16x64xf32>
    %c0_49 = arith.constant 0 : index
    %c0_50 = arith.constant 0 : index
    %c0_51 = arith.constant 0 : index
    %109 = vector.load %arg14[%c0_49, %c0_50, %c0_51] : memref<1x1x64xf32, #tpu.memory_space<vmem>>, vector<1x1x64xf32>
    %110 = vector.shape_cast %109 : vector<1x1x64xf32> to vector<1x64xf32>
    %111 = vector.broadcast %110 : vector<1x64xf32> to vector<16x64xf32>
    %112 = arith.addf %108, %111 : vector<16x64xf32>
    %cst_52 = arith.constant 0.000000e+00 : f32
    %113 = vector.broadcast %cst_52 : f32 to vector<16x64xf32>
    %114 = arith.maximumf %112, %113 : vector<16x64xf32>
    %115 = arith.truncf %114 : vector<16x64xf32> to vector<16x64xbf16>
    %c0_53 = arith.constant 0 : index
    %c0_54 = arith.constant 0 : index
    %c0_55 = arith.constant 0 : index
    %116 = vector.load %arg15[%c0_53, %c0_54, %c0_55] : memref<1x64x32xbf16, #tpu.memory_space<vmem>>, vector<1x64x32xbf16>
    %117 = vector.shape_cast %116 : vector<1x64x32xbf16> to vector<64x32xbf16>
    %cst_56 = arith.constant dense<0.000000e+00> : vector<16x32xf32>
    %118 = tpu.matmul %115, %117, %cst_56 {dimension_numbers = #tpu.dot_dimension_numbers<[1], [0], [0], [1], [0, 0, 1, 1], [], []>} : vector<16x64xbf16>, vector<64x32xbf16>, vector<16x32xf32> -> vector<16x32xf32>
    %c0_57 = arith.constant 0 : index
    %c0_58 = arith.constant 0 : index
    %c0_59 = arith.constant 0 : index
    %119 = vector.load %arg16[%c0_57, %c0_58, %c0_59] : memref<1x1x32xf32, #tpu.memory_space<vmem>>, vector<1x1x32xf32>
    %120 = vector.shape_cast %119 : vector<1x1x32xf32> to vector<1x32xf32>
    %121 = vector.broadcast %120 : vector<1x32xf32> to vector<16x32xf32>
    %122 = arith.addf %118, %121 : vector<16x32xf32>
    %123 = arith.addf %122, %104 : vector<16x32xf32>
    %c0_60 = arith.constant 0 : index
    %c0_61 = arith.constant 0 : index
    %c0_62 = arith.constant 0 : index
    %124 = vector.load %arg17[%c0_60, %c0_61, %c0_62] : memref<1x1x32xf32, #tpu.memory_space<vmem>>, vector<1x1x32xf32>
    %125 = vector.shape_cast %124 : vector<1x1x32xf32> to vector<1x32xf32>
    %c0_63 = arith.constant 0 : index
    %c0_64 = arith.constant 0 : index
    %c0_65 = arith.constant 0 : index
    %126 = vector.load %arg18[%c0_63, %c0_64, %c0_65] : memref<1x1x32xf32, #tpu.memory_space<vmem>>, vector<1x1x32xf32>
    %127 = vector.shape_cast %126 : vector<1x1x32xf32> to vector<1x32xf32>
    %cst_66 = arith.constant dense<0.000000e+00> : vector<16xf32>
    %128 = vector.multi_reduction <add>, %123, %cst_66 [1] : vector<16x32xf32> to vector<16xf32>
    %129 = vector.shape_cast %128 : vector<16xf32> to vector<16x1xf32>
    %cst_67 = arith.constant 3.200000e+01 : f32
    %130 = vector.broadcast %cst_67 : f32 to vector<16x1xf32>
    %131 = arith.divf %129, %130 : vector<16x1xf32>
    %132 = vector.broadcast %131 : vector<16x1xf32> to vector<16x32xf32>
    %133 = arith.subf %123, %132 : vector<16x32xf32>
    %134 = arith.mulf %133, %133 : vector<16x32xf32>
    %cst_68 = arith.constant dense<0.000000e+00> : vector<16xf32>
    %135 = vector.multi_reduction <add>, %134, %cst_68 [1] : vector<16x32xf32> to vector<16xf32>
    %136 = vector.shape_cast %135 : vector<16xf32> to vector<16x1xf32>
    %cst_69 = arith.constant 3.200000e+01 : f32
    %137 = vector.broadcast %cst_69 : f32 to vector<16x1xf32>
    %138 = arith.divf %136, %137 : vector<16x1xf32>
    %cst_70 = arith.constant 9.99999974E-6 : f32
    %139 = vector.broadcast %cst_70 : f32 to vector<16x1xf32>
    %140 = arith.addf %138, %139 : vector<16x1xf32>
    %141 = math.rsqrt %140 : vector<16x1xf32>
    %142 = vector.broadcast %141 : vector<16x1xf32> to vector<16x32xf32>
    %143 = arith.mulf %133, %142 : vector<16x32xf32>
    %144 = vector.broadcast %125 : vector<1x32xf32> to vector<16x32xf32>
    %145 = arith.mulf %143, %144 : vector<16x32xf32>
    %146 = vector.broadcast %127 : vector<1x32xf32> to vector<16x32xf32>
    %147 = arith.addf %145, %146 : vector<16x32xf32>
    %c0_71 = arith.constant 0 : index
    %c0_72 = arith.constant 0 : index
    %148 = vector.load %arg22[%c0_71, %c0_72] : memref<16x32xf32, #tpu.memory_space<vmem>>, vector<16x32xf32>
    tpu.vector_store %arg22[%c0_71, %c0_72], %147 {strides = array<i32>} : memref<16x32xf32, #tpu.memory_space<vmem>>, vector<16x32xf32>,
    %c1_i32 = arith.constant 1 : i32
    %149 = arith.cmpi eq, %arg1, %c1_i32 : i32
    %150 = arith.extui %149 : i1 to i32
    %c0_i32_73 = arith.constant 0 : i32
    %151 = arith.cmpi ne, %150, %c0_i32_73 : i32
    scf.if %151 {
      %152 = vector.shape_cast %147 : vector<16x32xf32> to vector<2x8x32xf32>
      %153 = vector.extract_strided_slice %152 {offsets = [0, 0, 0], sizes = [2, 1, 32], strides = [1, 1, 1]} : vector<2x8x32xf32> to vector<2x1x32xf32>
      %154 = vector.shape_cast %153 : vector<2x1x32xf32> to vector<2x32xf32>
      %155 = arith.truncf %154 : vector<2x32xf32> to vector<2x32xbf16>
      %c0_74 = arith.constant 0 : index
      %c0_75 = arith.constant 0 : index
      %156 = vector.load %arg19[%c0_74, %c0_75] : memref<32x128xbf16, #tpu.memory_space<vmem>>, vector<32x128xbf16>
      %cst_76 = arith.constant dense<0.000000e+00> : vector<2x128xf32>
      %157 = tpu.matmul %155, %156, %cst_76 {dimension_numbers = #tpu.dot_dimension_numbers<[1], [0], [0], [1], [0, 0, 1, 1], [], []>} : vector<2x32xbf16>, vector<32x128xbf16>, vector<2x128xf32> -> vector<2x128xf32>
      %c0_77 = arith.constant 0 : index
      %c0_78 = arith.constant 0 : index
      %158 = vector.load %arg20[%c0_77, %c0_78] : memref<1x128xf32, #tpu.memory_space<vmem>>, vector<1x128xf32>
      %159 = vector.broadcast %158 : vector<1x128xf32> to vector<2x128xf32>
      %160 = arith.addf %157, %159 : vector<2x128xf32>
      %cst_79 = arith.constant dense<0xFF800000> : vector<2xf32>
      %161 = vector.multi_reduction <maximumf>, %160, %cst_79 [1] : vector<2x128xf32> to vector<2xf32>
      %162 = vector.shape_cast %161 : vector<2xf32> to vector<2x1xf32>
      %163 = vector.broadcast %162 : vector<2x1xf32> to vector<2x128xf32>
      %164 = arith.subf %160, %163 : vector<2x128xf32>
      %165 = math.exp %164 : vector<2x128xf32>
      %cst_80 = arith.constant dense<0.000000e+00> : vector<2xf32>
      %166 = vector.multi_reduction <add>, %165, %cst_80 [1] : vector<2x128xf32> to vector<2xf32>
      %167 = vector.shape_cast %166 : vector<2xf32> to vector<2x1xf32>
      %168 = vector.broadcast %167 : vector<2x1xf32> to vector<2x128xf32>
      %169 = arith.divf %165, %168 : vector<2x128xf32>
      %c0_81 = arith.constant 0 : index
      %c0_82 = arith.constant 0 : index
      %170 = vector.load %arg21[%c0_81, %c0_82] : memref<2x128xf32, #tpu.memory_space<vmem>>, vector<2x128xf32>
      tpu.vector_store %arg21[%c0_81, %c0_82], %169 {strides = array<i32>} : memref<2x128xf32, #tpu.memory_space<vmem>>, vector<2x128xf32>,
    } else {
    }
    return
  }
  func.func @transform_0(%arg0: i32, %arg1: i32) -> (i32, i32, i32) {
    %c0_i32 = arith.constant 0 : i32
    %c0_i32_0 = arith.constant 0 : i32
    %c0_i32_1 = arith.constant 0 : i32
    return %arg0, %c0_i32, %c0_i32_0 : i32, i32, i32
  }
  func.func @transform_1(%arg0: i32, %arg1: i32) -> (i32, i32, i32) {
    %c0_i32 = arith.constant 0 : i32
    %c0_i32_0 = arith.constant 0 : i32
    %c0_i32_1 = arith.constant 0 : i32
    return %arg1, %c0_i32, %c0_i32_0 : i32, i32, i32
  }
  func.func @transform_2(%arg0: i32, %arg1: i32) -> (i32, i32, i32) {
    %c0_i32 = arith.constant 0 : i32
    %c0_i32_0 = arith.constant 0 : i32
    %c0_i32_1 = arith.constant 0 : i32
    return %arg1, %c0_i32, %c0_i32_0 : i32, i32, i32
  }
  func.func @transform_3(%arg0: i32, %arg1: i32) -> (i32, i32, i32) {
    %c0_i32 = arith.constant 0 : i32
    %c0_i32_0 = arith.constant 0 : i32
    %c0_i32_1 = arith.constant 0 : i32
    return %arg1, %c0_i32, %c0_i32_0 : i32, i32, i32
  }
  func.func @transform_4(%arg0: i32, %arg1: i32) -> (i32, i32, i32) {
    %c0_i32 = arith.constant 0 : i32
    %c0_i32_0 = arith.constant 0 : i32
    %c0_i32_1 = arith.constant 0 : i32
    return %arg1, %c0_i32, %c0_i32_0 : i32, i32, i32
  }
  func.func @transform_5(%arg0: i32, %arg1: i32) -> (i32, i32, i32) {
    %c0_i32 = arith.constant 0 : i32
    %c0_i32_0 = arith.constant 0 : i32
    %c0_i32_1 = arith.constant 0 : i32
    return %arg1, %c0_i32, %c0_i32_0 : i32, i32, i32
  }
  func.func @transform_6(%arg0: i32, %arg1: i32) -> (i32, i32, i32) {
    %c0_i32 = arith.constant 0 : i32
    %c0_i32_0 = arith.constant 0 : i32
    %c0_i32_1 = arith.constant 0 : i32
    return %arg1, %c0_i32, %c0_i32_0 : i32, i32, i32
  }
  func.func @transform_7(%arg0: i32, %arg1: i32) -> (i32, i32, i32) {
    %c0_i32 = arith.constant 0 : i32
    %c0_i32_0 = arith.constant 0 : i32
    %c0_i32_1 = arith.constant 0 : i32
    return %arg1, %c0_i32, %c0_i32_0 : i32, i32, i32
  }
  func.func @transform_8(%arg0: i32, %arg1: i32) -> (i32, i32, i32) {
    %c0_i32 = arith.constant 0 : i32
    %c0_i32_0 = arith.constant 0 : i32
    %c0_i32_1 = arith.constant 0 : i32
    return %arg1, %c0_i32, %c0_i32_0 : i32, i32, i32
  }
  func.func @transform_9(%arg0: i32, %arg1: i32) -> (i32, i32, i32) {
    %c0_i32 = arith.constant 0 : i32
    %c0_i32_0 = arith.constant 0 : i32
    %c0_i32_1 = arith.constant 0 : i32
    return %arg1, %c0_i32, %c0_i32_0 : i32, i32, i32
  }
  func.func @transform_10(%arg0: i32, %arg1: i32) -> (i32, i32, i32) {
    %c0_i32 = arith.constant 0 : i32
    %c0_i32_0 = arith.constant 0 : i32
    %c0_i32_1 = arith.constant 0 : i32
    return %arg1, %c0_i32, %c0_i32_0 : i32, i32, i32
  }
  func.func @transform_11(%arg0: i32, %arg1: i32) -> (i32, i32, i32) {
    %c0_i32 = arith.constant 0 : i32
    %c0_i32_0 = arith.constant 0 : i32
    %c0_i32_1 = arith.constant 0 : i32
    return %arg1, %c0_i32, %c0_i32_0 : i32, i32, i32
  }
  func.func @transform_12(%arg0: i32, %arg1: i32) -> (i32, i32, i32) {
    %c0_i32 = arith.constant 0 : i32
    %c0_i32_0 = arith.constant 0 : i32
    %c0_i32_1 = arith.constant 0 : i32
    return %arg1, %c0_i32, %c0_i32_0 : i32, i32, i32
  }
  func.func @transform_13(%arg0: i32, %arg1: i32) -> (i32, i32, i32) {
    %c0_i32 = arith.constant 0 : i32
    %c0_i32_0 = arith.constant 0 : i32
    %c0_i32_1 = arith.constant 0 : i32
    return %arg1, %c0_i32, %c0_i32_0 : i32, i32, i32
  }
  func.func @transform_14(%arg0: i32, %arg1: i32) -> (i32, i32, i32) {
    %c0_i32 = arith.constant 0 : i32
    %c0_i32_0 = arith.constant 0 : i32
    %c0_i32_1 = arith.constant 0 : i32
    return %arg1, %c0_i32, %c0_i32_0 : i32, i32, i32
  }
  func.func @transform_15(%arg0: i32, %arg1: i32) -> (i32, i32, i32) {
    %c0_i32 = arith.constant 0 : i32
    %c0_i32_0 = arith.constant 0 : i32
    %c0_i32_1 = arith.constant 0 : i32
    return %arg1, %c0_i32, %c0_i32_0 : i32, i32, i32
  }
  func.func @transform_16(%arg0: i32, %arg1: i32) -> (i32, i32, i32) {
    %c0_i32 = arith.constant 0 : i32
    %c0_i32_0 = arith.constant 0 : i32
    %c0_i32_1 = arith.constant 0 : i32
    return %arg1, %c0_i32, %c0_i32_0 : i32, i32, i32
  }
  func.func @transform_17(%arg0: i32, %arg1: i32) -> (i32, i32) {
    %c0_i32 = arith.constant 0 : i32
    %c0_i32_0 = arith.constant 0 : i32
    %c0_i32_1 = arith.constant 0 : i32
    return %c0_i32, %c0_i32_0 : i32, i32
  }
  func.func @transform_18(%arg0: i32, %arg1: i32) -> (i32, i32) {
    %c0_i32 = arith.constant 0 : i32
    %c0_i32_0 = arith.constant 0 : i32
    %c0_i32_1 = arith.constant 0 : i32
    return %c0_i32, %c0_i32_0 : i32, i32
  }
  func.func @transform_19(%arg0: i32, %arg1: i32) -> (i32, i32) {
    %c0_i32 = arith.constant 0 : i32
    %c0_i32_0 = arith.constant 0 : i32
    return %arg0, %c0_i32 : i32, i32
  }
}

</mosaic_0001>

<bundles_post_ra>
// kernel: tpu_custom_call.1
= control target key start
LH: loop header
LB: loop body
LE: loop exit
PB: predicated region body
PF: predicated region fallthrough
CT: control target
= control target key end

     0   :  { %s4004_s0 = inlined_call_operand.hbm [shape: f32[2,8,32], index: 0, kind: input, shape index: {}]   ;;  %s4005_s1 = inlined_call_operand.vmem [shape: bf16[2,32,32], index: 1, kind: input, shape index: {}]   ;;  %s4006_s2 = inlined_call_operand.hbm [shape: f32[2,1,32], index: 2, kind: input, shape index: {}]   ;;  %s4007_s3 = inlined_call_operand.vmem [shape: bf16[2,32,32], index: 3, kind: input, shape index: {}]   ;;  %s4008_s4 = inlined_call_operand.hbm [shape: f32[2,1,32], index: 4, kind: input, shape index: {}]   ;;  %s4009_s5 = inlined_call_operand.vmem [shape: bf16[2,32,32], index: 5, kind: input, shape index: {}]   ;;  %s4010_s6 = inlined_call_operand.hbm [shape: f32[2,1,32], index: 6, kind: input, shape index: {}]   ;;  %s4011_s7 = inlined_call_operand.hbm [shape: bf16[2,32,32], index: 7, kind: input, shape index: {}]   ;;  %s4012_s8 = inlined_call_operand.hbm [shape: f32[2,1,32], index: 8, kind: input, shape index: {}]   ;;  %s4013_s9 = inlined_call_operand.hbm [shape: f32[2,1,32], index: 9, kind: input, shape index: {}]   ;;  %s4014_s10 = inlined_call_operand.hbm [shape: f32[2,1,32], index: 10, kind: input, shape index: {}]   ;;  %s4015_s11 = inlined_call_operand.hbm [shape: bf16[2,32,64], index: 11, kind: input, shape index: {}]   ;;  %s4016_s12 = inlined_call_operand.hbm [shape: f32[2,1,64], index: 12, kind: input, shape index: {}]   ;;  %s4017_s13 = inlined_call_operand.vmem [shape: bf16[2,64,32], index: 13, kind: input, shape index: {}]   ;;  %s4018_s14 = inlined_call_operand.vmem [shape: f32[2,1,32], index: 14, kind: input, shape index: {}]   ;;  %s4019_s15 = inlined_call_operand.vmem [shape: f32[2,1,32], index: 15, kind: input, shape index: {}]   ;;  %s4020_s16 = inlined_call_operand.vmem [shape: f32[2,1,32], index: 16, kind: input, shape index: {}]   ;;  %s4021_s17 = inlined_call_operand.vmem [shape: bf16[32,128], index: 17, kind: input, shape index: {}]   ;;  %s4022_s18 = inlined_call_operand.vmem [shape: f32[1,128], index: 18, kind: input, shape index: {}]   ;;  %s4023_s19 = inlined_call_operand.hbm [shape: f32[2,128], index: 19, kind: output, shape index: {}]  }
   0x1   :  { %4043 = sst [smem:[#allocation33_spill]] %s4004_s0 }
   0x2   :  { %4044 = sst [smem:[#allocation34_spill]] %s4005_s1 }
   0x3   :  { %4045 = sst [smem:[#allocation35_spill]] %s4006_s2 }
   0x4   :  { %4046 = sst [smem:[#allocation36_spill]] %s4007_s3 }
   0x5   :  { %4047 = sst [smem:[#allocation37_spill]] %s4008_s4 }
   0x6   :  { %4048 = sst [smem:[#allocation38_spill]] %s4009_s5 }
   0x7   :  { %4049 = sst [smem:[#allocation39_spill]] %s4010_s6 }
   0x8   :  { %4050 = sst [smem:[#allocation40_spill]] %s4011_s7 }
   0x9   :  { %4051 = sst [smem:[#allocation41_spill]] %s4012_s8 }
   0xa   :  { %4052 = sst [smem:[#allocation42_spill]] %s4013_s9 }
   0xb   :  { %4053 = sst [smem:[#allocation43_spill]] %s4014_s10 }
   0xc   :  { %4054 = sst [smem:[#allocation44_spill]] %s4015_s11 }
   0xd   :  { %4055 = sst [smem:[#allocation45_spill]] %s4016_s12 }
   0xe   :  { %4056 = sst [smem:[#allocation46_spill]] %s4017_s13 }
   0xf   :  { %4057 = sst [smem:[#allocation47_spill]] %s4018_s14 }
  0x10   :  { %4058 = sst [smem:[#allocation48_spill]] %s4019_s15 }
  0x11   :  { %4059 = sst [smem:[#allocation49_spill]] %s4020_s16 }
  0x12   :  { %4060 = sst [smem:[#allocation50_spill]] %s4021_s17 }
  0x13   :  { %4061 = sst [smem:[#allocation51_spill]] %s4022_s18 }
  0x14   :  { %4062 = sst [smem:[#allocation52_spill]] %s4023_s19 }
  0x15   :  { %24 = vsyncpa [#allocation4], 0 }
  0x16   :  { %25 = vsyncpa [#allocation7], 0 }
  0x17   :  { %27 = vsyncpa [#allocation7 + $0x1], 0 }
  0x18   :  { %28 = vsyncpa [#allocation10], 0 }
  0x19   :  { %30 = vsyncpa [#allocation10 + $0x1], 0 }
  0x1a   :  { %31 = vsyncpa [#allocation13], 0 }
  0x1b   :  { %33 = vsyncpa [#allocation13 + $0x1], 0 }
  0x1c   :  { %34 = vsyncpa [#allocation16], 0 }
  0x1d   :  { %36 = vsyncpa [#allocation16 + $0x1], 0 }
  0x1e   :  { %37 = vsyncpa [#allocation19], 0 }
  0x1f   :  { %39 = vsyncpa [#allocation19 + $0x1], 0 }
  0x20   :  { %40 = vsyncpa [#allocation5], 0  ;;  %s3346_s0 = smov 0   ;;  %s3348_s30 = smov 0  }
  0x21   :  { %s3350_s20 = smov 0   ;;  %s3352_s21 = smov 0  }
  0x22   :  { %s3354_s1 = smov 0   ;;  %s3356_s22 = smov 0  }
  0x23 LB: > { %4063 = sst [smem:[#allocation28_spill]] %s3211_s20  ;;  %s55_s2 = sadd.s32 1, %s3219_s1  ;;  %s3223_s22 = sphi %s3356_s22, %s46_s22   ;;  %s3219_s1 = sphi %s3354_s1, %s4128_s1   ;;  %s3215_s21 = sphi %s3352_s21, %s4127_s21   ;;  %s3211_s20 = sphi %s3350_s20, %s4126_s20   ;;  %s3207_s30 = sphi %s3348_s30, %s4130_s30   ;;  %s3203_s0 = sphi %s3346_s0, %s4129_s0  }
  0x24   : > { %4064 = sst [smem:[#allocation29_spill]] %s3219_s1  ;;  %s117_s23 = sadd.s32 1, %s3211_s20 }
  0x25   : > { %4065 = sst [smem:[#allocation30_spill]] %s3223_s22  ;;  %p56_p0 = scmp.ge.s32.totalorder %s55_s2, 2 }
  0x26   : > { %p124_p1 = scmp.ne.s32.totalorder %s3211_s20, %s3207_s30  ;;  %p125_p2 = scmp.eq.s32.totalorder %s3223_s22, 0 }
  0x27   : > { %s4132_s2 = smov (%p56_p0, %s55_s2), 0  ;;  %p2712_p4 = scmp.lt.s32.totalorder %s3223_s22, 2 }
  0x28   : > { %4066 = sst [smem:[#allocation31_spill]] %s4132_s2  ;;  %p126_p3 = por %p125_p2, %p124_p1 }
  0x29   : > { %s114_s24 = ssub.s32 %s3219_s1, %s4132_s2  ;;  %s3387_s25 = sand.u32 1, %s3223_s22  }
  0x2a   : > { %p115_p5 = scmp.eq.s32.totalorder %s114_s24, 0  ;;  %s3390_s3 = sand.u32 1, %s3211_s20  }
  0x2b   : > { %s3393_s26 = sshll.u32 %s3219_s1, 4  ;;  %s4068_s19 = sld [smem:[#allocation35_spill]] }
  0x2c   : > { %s3396_s27 = scalar_select %p115_p5, %s3211_s20, %s117_s23  }
  0x2d   : > { %s619_s2 = scalar_lea.vmem [#allocation6], %s3390_s3  ;;  %p3405_p6 = pnand %p2712_p4, %p126_p3 }
  0x2e   : > { %4067 = sst [smem:[#allocation32_spill]] %s3396_s27  ;;  %s626_s17 = sshll.u32 %s619_s2, 4  ;;  %s3409_s17 = int_to_ptr.vmem [resolvable:$true] %s626_s17 }
  0x2f   : > { %s4069_s24 = scalar_select %p3405_p6, 1, 0 }
  0x30   : > { %p3416_p8 = pneg %p3405_p6 }
  0x31   : > { %s3402_s18 = scalar_lea.hbm %s4068_s19, %s3393_s26  ;;  %s2830_s20 = scalar_lea.hbm %s4068_s19, 32 }
  0x32   : > { %s2825_s27 = scalar_lea.hbm %s3402_s18, 16  ;;  %p2831_p11 = scmp.lt.u32.totalorder %s3402_s18, %s4068_s19 }
  0x33   : > { %p2826_p7 = scmp.ne.s32.totalorder %s3402_s18, %s2825_s27  ;;  %p2832_p12 = scmp.lt.u32.totalorder %s2830_s20, %s2825_s27 }
  0x34   : > { %s4070_s28 = scalar_select %p3416_p8, 1, 0 }
  0x35   : > { %p2828_p9 = pnand %p3416_p8, %p2826_p7  ;;  %p2833_p13 = por %p2832_p12, %p2831_p11 }
  0x36   : > { %p2834_p0 = scmp.lt.u32.totalorder %s2825_s27, %s3402_s18 }
  0x37   : > { %p2829_p10 = pneg %p2828_p9 }
  0x38   : > { %p2835_p1 = por %p2834_p0, %p2833_p13 }
  0x3a   : > { %p2836_p2 = pnand %p2835_p1, %p2829_p10 }
  0x3c   : > { %2839 = shalt.err (!%p2836_p2)
}
  0x3d   : > { %s2840_s23 = scalar_lea.vmem %s3409_s17, 16  ;;  %s3225_s2 = smov [#allocation6]  }
  0x3e   : > { %p2841_p3 = scmp.ne.s32.totalorder %s3409_s17, %s2840_s23  ;;  %s2845_s29 = sshll.u32 %s3225_s2, 4  ;;  %s2846_s29 = int_to_ptr.vmem [resolvable:$false] %s2845_s29 }
  0x3f   : > { %s2847_s15 = scalar_lea.vmem %s2846_s29, 32  ;;  %p2848_p7 = scmp.lt.s32.totalorder %s3409_s17, %s2846_s29 }
  0x40   : > { %p2843_p4 = pnand %p2841_p3, %p3416_p8  ;;  %p2849_p9 = scmp.lt.s32.totalorder %s2847_s15, %s2840_s23 }
  0x42   : > { %p2844_p5 = pneg %p2843_p4  ;;  %p2850_p11 = por %p2849_p9, %p2848_p7 }
  0x44   : > { %p2851_p12 = pnand %p2850_p11, %p2844_p5 }
  0x46   : > { %2854 = shalt.err (!%p2851_p12)
}
  0x47   : > { %s4071_s16 = scalar_lea.sflag [#allocation7], %s3387_s25  ;;  %s4072_s6 = sld [smem:[#allocation39_spill]] }
  0x48   : > { %2686 = dma.hbm_to_vmem [thread:$0]  (!%p3405_p6), %s3402_s18, 16, %s3409_s17, %s4071_s16  }
  0x49   : > { %s669_s23 = scalar_lea.vmem [#allocation9], %s3390_s3 }
  0x4a   : > { %s676_s29 = sshll.u32 %s669_s23, 4  ;;  %s677_s29 = int_to_ptr.vmem [resolvable:$true] %s676_s29 }
  0x4d   : > { %s3445_s2 = scalar_lea.hbm %s4072_s6, %s3393_s26  ;;  %s2860_s18 = scalar_lea.hbm %s4072_s6, 32 }
  0x4e   : > { %s2855_s19 = scalar_lea.hbm %s3445_s2, 16  ;;  %p2861_p1 = scmp.lt.u32.totalorder %s3445_s2, %s4072_s6 }
  0x4f   : > { %p2856_p10 = scmp.ne.s32.totalorder %s3445_s2, %s2855_s19  ;;  %p2862_p2 = scmp.lt.u32.totalorder %s2860_s18, %s2855_s19 }
  0x50   : > { %p2864_p4 = scmp.lt.u32.totalorder %s2855_s19, %s3445_s2 }
  0x51   : > { %p2858_p13 = pnand %p2856_p10, %p3416_p8  ;;  %p2863_p3 = por %p2862_p2, %p2861_p1 }
  0x53   : > { %p2859_p0 = pneg %p2858_p13  ;;  %p2865_p5 = por %p2864_p4, %p2863_p3 }
  0x55   : > { %p2866_p7 = pnand %p2865_p5, %p2859_p0 }
  0x57   : > { %2869 = shalt.err (!%p2866_p7)
}
  0x58   : > { %s2870_s27 = scalar_lea.vmem %s677_s29, 16  ;;  %s3226_s23 = smov [#allocation9]  }
  0x59   : > { %p2871_p9 = scmp.ne.s32.totalorder %s677_s29, %s2870_s27  ;;  %s2875_s15 = sshll.u32 %s3226_s23, 4  ;;  %s2876_s15 = int_to_ptr.vmem [resolvable:$false] %s2875_s15 }
  0x5a   : > { %s2877_s14 = scalar_lea.vmem %s2876_s15, 32  ;;  %p2878_p10 = scmp.lt.s32.totalorder %s677_s29, %s2876_s15 }
  0x5b   : > { %p2873_p11 = pnand %p2871_p9, %p3416_p8  ;;  %p2879_p13 = scmp.lt.s32.totalorder %s2877_s14, %s2870_s27 }
  0x5d   : > { %p2874_p12 = pneg %p2873_p11  ;;  %p2880_p6 = por %p2879_p13, %p2878_p10 }
  0x5f   : > { %p2881_p1 = pnand %p2880_p6, %p2874_p12 }
  0x61   : > { %2884 = shalt.err (!%p2881_p1)
}
  0x62   : > { %p4073_p2 = scmp.ne.s32.totalorder %s4069_s24, 0  ;;  %s4074_s19 = scalar_lea.sflag [#allocation10], %s3387_s25 }
  0x63   : > { %s4075_s8 = sld [smem:[#allocation41_spill]]  ;;  %s707_s15 = scalar_lea.vmem [#allocation12], %s3390_s3 }
  0x64   : > { %2692 = dma.hbm_to_vmem [thread:$0]  (!%p4073_p2), %s3445_s2, 16, %s677_s29, %s4074_s19  }
  0x65   : > { %s714_s20 = sshll.u32 %s707_s15, 4  ;;  %s715_s20 = int_to_ptr.vmem [resolvable:$true] %s714_s20 }
  0x69   : > { %s3472_s16 = scalar_lea.hbm %s4075_s8, %s3393_s26  ;;  %s2890_s29 = scalar_lea.hbm %s4075_s8, 32 }
  0x6a   : > { %s2885_s23 = scalar_lea.hbm %s3472_s16, 16  ;;  %p2891_p4 = scmp.lt.u32.totalorder %s3472_s16, %s4075_s8 }
  0x6b   : > { %p2886_p6 = scmp.ne.s32.totalorder %s3472_s16, %s2885_s23  ;;  %p2892_p5 = scmp.lt.u32.totalorder %s2890_s29, %s2885_s23 }
  0x6c   : > { %p2894_p9 = scmp.lt.u32.totalorder %s2885_s23, %s3472_s16 }
  0x6d   : > { %p2888_p0 = pnand %p2886_p6, %p3416_p8  ;;  %p2893_p7 = por %p2892_p5, %p2891_p4 }
  0x6f   : > { %p2889_p3 = pneg %p2888_p0  ;;  %p2895_p11 = por %p2894_p9, %p2893_p7 }
  0x71   : > { %p2896_p12 = pnand %p2895_p11, %p2889_p3 }
  0x73   : > { %2899 = shalt.err (!%p2896_p12)
}
  0x74   : > { %s2900_s18 = scalar_lea.vmem %s715_s20, 16  ;;  %s3227_s15 = smov [#allocation12]  }
  0x75   : > { %p2901_p10 = scmp.ne.s32.totalorder %s715_s20, %s2900_s18  ;;  %s2905_s27 = sshll.u32 %s3227_s15, 4  ;;  %s2906_s27 = int_to_ptr.vmem [resolvable:$false] %s2905_s27 }
  0x76   : > { %s2907_s14 = scalar_lea.vmem %s2906_s27, 32  ;;  %p2908_p6 = scmp.lt.s32.totalorder %s715_s20, %s2906_s27 }
  0x77   : > { %p2903_p13 = pnand %p2901_p10, %p3416_p8  ;;  %p2909_p0 = scmp.lt.s32.totalorder %s2907_s14, %s2900_s18 }
  0x79   : > { %p2904_p1 = pneg %p2903_p13  ;;  %p2910_p2 = por %p2909_p0, %p2908_p6 }
  0x7b   : > { %p2911_p4 = pnand %p2910_p2, %p2904_p1 }
  0x7d   : > { %2914 = shalt.err (!%p2911_p4)
}
  0x7e   : > { %p4076_p5 = scmp.ne.s32.totalorder %s4069_s24, 0  ;;  %s4077_s23 = scalar_lea.sflag [#allocation13], %s3387_s25 }
  0x7f   : > { %s4078_s10 = sld [smem:[#allocation43_spill]]  ;;  %s741_s27 = scalar_lea.vmem [#allocation15], %s3390_s3 }
  0x80   : > { %2698 = dma.hbm_to_vmem [thread:$0]  (!%p4076_p5), %s3472_s16, 16, %s715_s20, %s4077_s23  }
  0x81   : > { %s748_s17 = sshll.u32 %s741_s27, 4  ;;  %s749_s17 = int_to_ptr.vmem [resolvable:$true] %s748_s17 }
  0x85   : > { %s3499_s19 = scalar_lea.hbm %s4078_s10, %s3393_s26  ;;  %s2920_s20 = scalar_lea.hbm %s4078_s10, 32 }
  0x86   : > { %s2915_s15 = scalar_lea.hbm %s3499_s19, 16  ;;  %p2921_p9 = scmp.lt.u32.totalorder %s3499_s19, %s4078_s10 }
  0x87   : > { %p2916_p2 = scmp.ne.s32.totalorder %s3499_s19, %s2915_s15  ;;  %p2922_p11 = scmp.lt.u32.totalorder %s2920_s20, %s2915_s15 }
  0x88   : > { %p2924_p10 = scmp.lt.u32.totalorder %s2915_s15, %s3499_s19 }
  0x89   : > { %p2918_p3 = pnand %p2916_p2, %p3416_p8  ;;  %p2923_p12 = por %p2922_p11, %p2921_p9 }
  0x8b   : > { %p2919_p7 = pneg %p2918_p3  ;;  %p2925_p13 = por %p2924_p10, %p2923_p12 }
  0x8d   : > { %p2926_p1 = pnand %p2925_p13, %p2919_p7 }
  0x8f   : > { %2929 = shalt.err (!%p2926_p1)
}
  0x90   : > { %s2930_s29 = scalar_lea.vmem %s749_s17, 16  ;;  %s3228_s27 = smov [#allocation15]  }
  0x91   : > { %p2931_p6 = scmp.ne.s32.totalorder %s749_s17, %s2930_s29  ;;  %s2935_s18 = sshll.u32 %s3228_s27, 4  ;;  %s2936_s18 = int_to_ptr.vmem [resolvable:$false] %s2935_s18 }
  0x92   : > { %s2937_s14 = scalar_lea.vmem %s2936_s18, 32  ;;  %p2938_p2 = scmp.lt.s32.totalorder %s749_s17, %s2936_s18 }
  0x93   : > { %p2933_p0 = pnand %p2931_p6, %p3416_p8  ;;  %p2939_p3 = scmp.lt.s32.totalorder %s2937_s14, %s2930_s29 }
  0x95   : > { %p2934_p4 = pneg %p2933_p0  ;;  %p2940_p5 = por %p2939_p3, %p2938_p2 }
  0x97   : > { %p2941_p9 = pnand %p2940_p5, %p2934_p4 }
  0x99   : > { %2944 = shalt.err (!%p2941_p9)
}
  0x9a   : > { %p4079_p11 = scmp.ne.s32.totalorder %s4069_s24, 0  ;;  %s4080_s15 = scalar_lea.sflag [#allocation16], %s3387_s25 }
  0x9b   : > { %s3523_s16 = sadd.s32 4294967295, %s3223_s22   ;;  %p130_p5 = scmp.ne.s32.totalorder %s3207_s30, %s3203_s0 }
  0x9c   : > { %2704 = dma.hbm_to_vmem [thread:$0]  (!%p4079_p11), %s3499_s19, 16, %s749_s17, %s4080_s15  }
  0x9d   : > { %p4034_p7 = scmp.eq.s32.totalorder %s3523_s16, 0  ;;  %p2424_p12 = scmp.ge.s32.totalorder %s3223_s22, 1 }
  0x9e   : > { %p573_p10 = scmp.lt.s32.totalorder %s3223_s22, 3  ;;  %s3229_s19 = smov [#allocation3]  }
  0x9f   : > { %p3532_p13 = por %p4034_p7, %p130_p5  ;;  %s588_s17 = sshll.u32 %s3229_s19, 4  ;;  %s3542_s17 = int_to_ptr.vmem [resolvable:$true] %s588_s17 }
  0xa0   : > { %p3536_p1 = pnand %p2424_p12, %p573_p10  ;;  %s4084_s4 = sld [smem:[#allocation37_spill]] }
  0xa1   : > { %s4081_s18 = scalar_select %p3532_p13, 1, 0 }
  0xa2   : > { %s4082_s20 = scalar_select %p3536_p1, 1, 0 }
  0xa3   : > { %p2679_p6 = pneg %p3536_p1  ;;  %s644_s27 = scalar_lea.vmem [#allocation8], %s3390_s3 }
  0xa4   : > { %s651_s14 = sshll.u32 %s644_s27, 4  ;;  %s4085_s8 = sld [smem:[#allocation33_spill]]  ;;  %s3558_s14 = int_to_ptr.vmem [resolvable:$true] %s651_s14 }
  0xa5   : > { %p3546_p0 = pnand %p2679_p6, %p4034_p7 }
  0xa6   : > { %s3554_s29 = scalar_lea.hbm %s4084_s4, %s3393_s26 }
  0xa7   : > { %p2947_p2 = pneg %p3546_p0 }
  0xaa   : > { %s2945_s10 = scalar_lea.hbm %s4085_s8, 256 }
  0xab   : > { %p2946_p4 = scmp.ne.s32.totalorder %s4085_s8, %s2945_s10  ;;  %p2952_p5 = scmp.lt.u32.totalorder %s2945_s10, %s4085_s8 }
  0xad   : > { %p2948_p3 = pnand %p2947_p2, %p2946_p4 }
  0xaf   : > { %p2949_p9 = pneg %p2948_p3 }
  0xb1   : > { %p2954_p12 = pnand %p2952_p5, %p2949_p9 }
  0xb3   : > { %2957 = shalt.err (!%p2954_p12)
}
  0xb4   : > { %s2958_s27 = scalar_lea.vmem %s3542_s17, 256  ;;  %p2966_p13 = scmp.lt.s32.totalorder %s3542_s17, %s3542_s17 }
  0xb5   : > { %p2959_p10 = scmp.ne.s32.totalorder %s3542_s17, %s2958_s27  ;;  %p2967_p1 = scmp.lt.s32.totalorder %s2958_s27, %s2958_s27 }
  0xb7   : > { %p2961_p6 = pnand %p2959_p10, %p2947_p2  ;;  %p2968_p11 = por %p2967_p1, %p2966_p13 }
  0xb9   : > { %p2962_p7 = pneg %p2961_p6 }
  0xbb   : > { %p2969_p8 = pnand %p2968_p11, %p2962_p7 }
  0xbd   : > { %2972 = shalt.err (!%p2969_p8)
}
  0xbe   : > { %s3230_s6 = smov 128   ;;  %s3231_s10 = smov 8  }
  0xbf   : > { %2682 = dma.hbm_to_vmem [thread:$0]  (!%p3546_p0), %s4085_s8, 256, %s3542_s17, [#allocation4], %s3230_s6, %s3230_s6, %s3231_s10  }
  0xc0   : > { %s2973_s19 = scalar_lea.hbm %s3554_s29, 16  ;;  %p4086_p2 = scmp.ne.s32.totalorder %s4070_s28, 0 }
  0xc1   : > { %p2974_p4 = scmp.ne.s32.totalorder %s3554_s29, %s2973_s19  ;;  %s2978_s27 = scalar_lea.hbm %s4084_s4, 32 }
  0xc2   : > { %p2979_p8 = scmp.lt.u32.totalorder %s3554_s29, %s4084_s4  ;;  %p2980_p7 = scmp.lt.u32.totalorder %s2978_s27, %s2973_s19 }
  0xc3   : > { %p2976_p13 = pnand %p2974_p4, %p4086_p2  ;;  %p2982_p3 = scmp.lt.u32.totalorder %s2973_s19, %s3554_s29 }
  0xc4   : > { %p2981_p1 = por %p2980_p7, %p2979_p8 }
  0xc5   : > { %p2977_p11 = pneg %p2976_p13 }
  0xc6   : > { %p2983_p9 = por %p2982_p3, %p2981_p1 }
  0xc8   : > { %p2984_p5 = pnand %p2983_p9, %p2977_p11 }
  0xca   : > { %2987 = shalt.err (!%p2984_p5)
}
  0xcb   : > { %s2988_s17 = scalar_lea.vmem %s3558_s14, 16  ;;  %s3232_s0 = smov [#allocation8]  }
  0xcc   : > { %p2989_p0 = scmp.ne.s32.totalorder %s3558_s14, %s2988_s17  ;;  %s2993_s6 = sshll.u32 %s3232_s0, 4  ;;  %s2994_s6 = int_to_ptr.vmem [resolvable:$false] %s2993_s6 }
  0xcd   : > { %s2995_s5 = scalar_lea.vmem %s2994_s6, 32  ;;  %p2996_p6 = scmp.lt.s32.totalorder %s3558_s14, %s2994_s6 }
  0xce   : > { %p2991_p12 = pnand %p2989_p0, %p4086_p2  ;;  %p2997_p4 = scmp.lt.s32.totalorder %s2995_s5, %s2988_s17 }
  0xd0   : > { %p2992_p10 = pneg %p2991_p12  ;;  %p2998_p13 = por %p2997_p4, %p2996_p6 }
  0xd2   : > { %p2999_p8 = pnand %p2998_p13, %p2992_p10 }
  0xd4   : > { %3002 = shalt.err (!%p2999_p8)
}
  0xd5   : > { %p4087_p11 = scmp.ne.s32.totalorder %s4069_s24, 0  ;;  %s4088_s15 = scalar_lea.sflag [#allocation7], %s3387_s25 }
  0xd6   : > { %s2500_s10 = sshll.u32 %s3219_s1, 8  ;;  %s4089_s7 = sld [smem:[#allocation40_spill]] }
  0xd7   : > { %2689 = dma.hbm_to_vmem [thread:$0]  (!%p4087_p11), %s3554_s29, 16, %s3558_s14, %s4088_s15  }
  0xd8   : > { %s4090_s23 = sshll.u32 %s3390_s3, 4 }
  0xd9   : > { %s687_s2 = scalar_lea.vmem [#allocation11], %s4090_s23 }
  0xda   : > { %s694_s27 = sshll.u32 %s687_s2, 4  ;;  %s3614_s27 = int_to_ptr.vmem [resolvable:$true] %s694_s27 }
  0xdc   : > { %s3610_s19 = scalar_lea.hbm %s4089_s7, %s2500_s10  ;;  %s3008_s0 = scalar_lea.hbm %s4089_s7, 512 }
  0xdd   : > { %s3003_s17 = scalar_lea.hbm %s3610_s19, 256  ;;  %p3009_p9 = scmp.lt.u32.totalorder %s3610_s19, %s4089_s7 }
  0xde   : > { %p3004_p7 = scmp.ne.s32.totalorder %s3610_s19, %s3003_s17  ;;  %p3010_p5 = scmp.lt.u32.totalorder %s3008_s0, %s3003_s17 }
  0xdf   : > { %p3012_p12 = scmp.lt.u32.totalorder %s3003_s17, %s3610_s19 }
  0xe0   : > { %p3006_p1 = pnand %p3004_p7, %p4086_p2  ;;  %p3011_p0 = por %p3010_p5, %p3009_p9 }
  0xe2   : > { %p3007_p3 = pneg %p3006_p1  ;;  %p3013_p10 = por %p3012_p12, %p3011_p0 }
  0xe4   : > { %p3014_p6 = pnand %p3013_p10, %p3007_p3 }
  0xe6   : > { %3017 = shalt.err (!%p3014_p6)
}
  0xe7   : > { %s3018_s15 = scalar_lea.vmem %s3614_s27, 256  ;;  %s3233_s13 = smov [#allocation11]  }
  0xe8   : > { %p3019_p4 = scmp.ne.s32.totalorder %s3614_s27, %s3018_s15  ;;  %s3023_s22 = sshll.u32 %s3233_s13, 4  ;;  %s3024_s22 = int_to_ptr.vmem [resolvable:$false] %s3023_s22 }
  0xe9   : > { %s3025_s23 = scalar_lea.vmem %s3024_s22, 512  ;;  %p3026_p7 = scmp.lt.s32.totalorder %s3614_s27, %s3024_s22 }
  0xea   : > { %p3021_p13 = pnand %p3019_p4, %p4086_p2  ;;  %p3027_p1 = scmp.lt.s32.totalorder %s3025_s23, %s3018_s15 }
  0xec   : > { %p3022_p8 = pneg %p3021_p13  ;;  %p3028_p9 = por %p3027_p1, %p3026_p7 }
  0xee   : > { %p3029_p5 = pnand %p3028_p9, %p3022_p8 }
  0xf0   : > { %3032 = shalt.err (!%p3029_p5)
}
  0xf1   : > { %s3234_s2 = smov 64   ;;  %s3235_s17 = smov 4  }
  0xf2   : > { %s4091_s29 = scalar_lea.sflag [#allocation10], %s3387_s25  ;;  %s4092_s9 = sld [smem:[#allocation42_spill]] }
  0xf3   : > { %2695 = dma.hbm_to_vmem [thread:$0]  (!%p4087_p11), %s3610_s19, 256, %s3614_s27, %s4091_s29, %s3234_s2, %s3234_s2, %s3235_s17  }
  0xf4   : > { %s724_s5 = scalar_lea.vmem [#allocation14], %s3390_s3 }
  0xf5   : > { %s731_s15 = sshll.u32 %s724_s5, 4  ;;  %s732_s15 = int_to_ptr.vmem [resolvable:$true] %s731_s15 }
  0xf8   : > { %s3646_s6 = scalar_lea.hbm %s4092_s9, %s3393_s26  ;;  %s3038_s19 = scalar_lea.hbm %s4092_s9, 32 }
  0xf9   : > { %s3033_s13 = scalar_lea.hbm %s3646_s6, 16  ;;  %p3039_p10 = scmp.lt.u32.totalorder %s3646_s6, %s4092_s9 }
  0xfa   : > { %p3034_p3 = scmp.ne.s32.totalorder %s3646_s6, %s3033_s13  ;;  %p3040_p6 = scmp.lt.u32.totalorder %s3038_s19, %s3033_s13 }
  0xfb   : > { %p3042_p13 = scmp.lt.u32.totalorder %s3033_s13, %s3646_s6 }
  0xfc   : > { %p3036_p0 = pnand %p3034_p3, %p4086_p2  ;;  %p3041_p4 = por %p3040_p6, %p3039_p10 }
  0xfe   : > { %p3037_p12 = pneg %p3036_p0  ;;  %p3043_p8 = por %p3042_p13, %p3041_p4 }
 0x100   : > { %p3044_p7 = pnand %p3043_p8, %p3037_p12 }
 0x102   : > { %3047 = shalt.err (!%p3044_p7)
}
 0x103   : > { %s3048_s14 = scalar_lea.vmem %s732_s15, 16  ;;  %s3236_s0 = smov [#allocation14]  }
 0x104   : > { %p3049_p1 = scmp.ne.s32.totalorder %s732_s15, %s3048_s14  ;;  %s3053_s5 = sshll.u32 %s3236_s0, 4  ;;  %s3054_s5 = int_to_ptr.vmem [resolvable:$false] %s3053_s5 }
 0x105   : > { %s3055_s22 = scalar_lea.vmem %s3054_s5, 32  ;;  %p3056_p3 = scmp.lt.s32.totalorder %s732_s15, %s3054_s5 }
 0x106   : > { %p3051_p9 = pnand %p3049_p1, %p4086_p2  ;;  %p3057_p0 = scmp.lt.s32.totalorder %s3055_s22, %s3048_s14 }
 0x108   : > { %p3052_p5 = pneg %p3051_p9  ;;  %p3058_p11 = por %p3057_p0, %p3056_p3 }
 0x10a   : > { %p3059_p6 = pnand %p3058_p11, %p3052_p5 }
 0x10c   : > { %3062 = shalt.err (!%p3059_p6)
}
 0x10d   : > { %p4093_p10 = scmp.ne.s32.totalorder %s4069_s24, 0  ;;  %s4094_s13 = scalar_lea.sflag [#allocation13], %s3387_s25 }
 0x10e   : > { %s4095_s11 = sld [smem:[#allocation44_spill]]  ;;  %s4096_s29 = sshll.u32 %s3390_s3, 4 }
 0x10f   : > { %2701 = dma.hbm_to_vmem [thread:$0]  (!%p4093_p10), %s3646_s6, 16, %s732_s15, %s4094_s13  }
 0x110   : > { %s759_s14 = scalar_lea.vmem [#allocation17], %s4096_s29 }
 0x111   : > { %s766_s0 = sshll.u32 %s759_s14, 4  ;;  %s3677_s0 = int_to_ptr.vmem [resolvable:$true] %s766_s0 }
 0x114   : > { %s3673_s27 = scalar_lea.hbm %s4095_s11, %s2500_s10  ;;  %s3068_s22 = scalar_lea.hbm %s4095_s11, 512 }
 0x115   : > { %s3063_s5 = scalar_lea.hbm %s3673_s27, 256  ;;  %p3069_p13 = scmp.lt.u32.totalorder %s3673_s27, %s4095_s11 }
 0x116   : > { %p3064_p11 = scmp.ne.s32.totalorder %s3673_s27, %s3063_s5  ;;  %p3070_p8 = scmp.lt.u32.totalorder %s3068_s22, %s3063_s5 }
 0x117   : > { %p3072_p1 = scmp.lt.u32.totalorder %s3063_s5, %s3673_s27 }
 0x118   : > { %p3066_p12 = pnand %p3064_p11, %p4086_p2  ;;  %p3071_p7 = por %p3070_p8, %p3069_p13 }
 0x11a   : > { %p3067_p4 = pneg %p3066_p12  ;;  %p3073_p9 = por %p3072_p1, %p3071_p7 }
 0x11c   : > { %p3074_p5 = pnand %p3073_p9, %p3067_p4 }
 0x11e   : > { %3077 = shalt.err (!%p3074_p5)
}
 0x11f   : > { %s3078_s23 = scalar_lea.vmem %s3677_s0, 256  ;;  %s3237_s19 = smov [#allocation17]  }
 0x120   : > { %p3079_p3 = scmp.ne.s32.totalorder %s3677_s0, %s3078_s23  ;;  %s3083_s29 = sshll.u32 %s3237_s19, 4  ;;  %s3084_s29 = int_to_ptr.vmem [resolvable:$false] %s3083_s29 }
 0x121   : > { %s3085_s14 = scalar_lea.vmem %s3084_s29, 512  ;;  %p3086_p11 = scmp.lt.s32.totalorder %s3677_s0, %s3084_s29 }
 0x122   : > { %p3081_p0 = pnand %p3079_p3, %p4086_p2  ;;  %p3087_p12 = scmp.lt.s32.totalorder %s3085_s14, %s3078_s23 }
 0x124   : > { %p3082_p6 = pneg %p3081_p0  ;;  %p3088_p13 = por %p3087_p12, %p3086_p11 }
 0x126   : > { %p3089_p8 = pnand %p3088_p13, %p3082_p6 }
 0x128   : > { %3092 = shalt.err (!%p3089_p8)
}
 0x129   : > { %s4097_s5 = scalar_lea.sflag [#allocation16], %s3387_s25  ;;  %s4098_s12 = sld [smem:[#allocation45_spill]] }
 0x12a   : > { %2707 = dma.hbm_to_vmem [thread:$0]  (!%p4093_p10), %s3673_s27, 256, %s3677_s0, %s4097_s5, %s3234_s2, %s3234_s2, %s3235_s17  }
 0x12b   : > { %s779_s10 = scalar_lea.vmem [#allocation18], %s3390_s3  ;;  %s777_s25 = scalar_lea.sflag [#allocation19], %s3390_s3 }
 0x12c   : > { %s786_s13 = sshll.u32 %s779_s10, 4  ;;  %s787_s13 = int_to_ptr.vmem [resolvable:$true] %s786_s13 }
 0x12f   : > { %s3709_s22 = scalar_lea.hbm %s4098_s12, %s3393_s26  ;;  %s3098_s17 = scalar_lea.hbm %s4098_s12, 32 }
 0x130   : > { %s3093_s23 = scalar_lea.hbm %s3709_s22, 16  ;;  %p3099_p9 = scmp.lt.u32.totalorder %s3709_s22, %s4098_s12 }
 0x131   : > { %p3094_p4 = scmp.ne.s32.totalorder %s3709_s22, %s3093_s23  ;;  %p3100_p5 = scmp.lt.u32.totalorder %s3098_s17, %s3093_s23 }
 0x132   : > { %p3102_p0 = scmp.lt.u32.totalorder %s3093_s23, %s3709_s22 }
 0x133   : > { %p3096_p7 = pnand %p3094_p4, %p4086_p2  ;;  %p3101_p3 = por %p3100_p5, %p3099_p9 }
 0x135   : > { %p3097_p1 = pneg %p3096_p7  ;;  %p3103_p6 = por %p3102_p0, %p3101_p3 }
 0x137   : > { %p3104_p11 = pnand %p3103_p6, %p3097_p1 }
 0x139   : > { %3107 = shalt.err (!%p3104_p11)
}
 0x13a   : > { %s3108_s3 = scalar_lea.vmem %s787_s13, 16  ;;  %s3238_s0 = smov [#allocation18]  }
 0x13b   : > { %p3109_p12 = scmp.ne.s32.totalorder %s787_s13, %s3108_s3  ;;  %s3113_s29 = sshll.u32 %s3238_s0, 4  ;;  %s3114_s29 = int_to_ptr.vmem [resolvable:$false] %s3113_s29 }
 0x13c   : > { %s3115_s14 = scalar_lea.vmem %s3114_s29, 32  ;;  %p3116_p4 = scmp.lt.s32.totalorder %s787_s13, %s3114_s29 }
 0x13d   : > { %p3111_p13 = pnand %p3109_p12, %p4086_p2  ;;  %p3117_p7 = scmp.lt.s32.totalorder %s3115_s14, %s3108_s3 }
 0x13f   : > { %p3112_p8 = pneg %p3111_p13  ;;  %p3118_p10 = por %p3117_p7, %p3116_p4 }
 0x141   : > { %p3119_p5 = pnand %p3118_p10, %p3112_p8 }
 0x143   : > { %3122 = shalt.err (!%p3119_p5)
}
 0x144   : > { %p4099_p9 = scmp.ne.s32.totalorder %s4069_s24, 0  ;;  %p4100_p1 = scmp.ne.s32.totalorder %s4082_s20, 0 }
 0x145   : > { %p4101_p3 = scmp.eq.s32.totalorder (!%p4100_p1), %s3523_s16, 0 }
 0x146   : > { %2710 = dma.hbm_to_vmem [thread:$0]  (!%p4099_p9), %s3709_s22, 16, %s787_s13, %s777_s25  }
 0x147   : > { %821 = sbr.rel (%p4100_p1) target bundleno = 3284 (0xcd4), region = 96 }
 0x14e   : > { %3174 = dma.done.wait (%p4101_p3), [#allocation4], 256   ;;  %p4102_p2 = pmov %p4101_p3 }
 0x14f   : > { %s827_s28 = sand.u32 1, %s3523_s16   ;;  %s3738_s5 = sand.u32 1, %s3207_s30  }
 0x150   : > { %3176 = vsyncadd (%p4102_p2), [#allocation4], 4294967040  ;;  %s828_s6 = scalar_lea.sflag [#allocation7], %s827_s28  ;;  %p4103_p10 = scmp.ne.s32.totalorder %s4081_s18, 0 }
 0x152   : > { %3178 = dma.done.wait (%p4103_p10), %s828_s6, 32  }
 0x153   : > { %3180 = vsyncadd (%p4103_p10), %s828_s6, 4294967264  ;;  %s844_s15 = scalar_lea.sflag [#allocation10], %s827_s28 }
 0x154   : > { %3182 = dma.done.wait (%p4103_p10), %s844_s15, 272  }
 0x155   : > { %3184 = vsyncadd (%p4103_p10), %s844_s15, 4294967024  ;;  %s2442_s10 = sshll.u32 %s3738_s5, 4  ;;  %s861_s25 = scalar_lea.sflag [#allocation13], %s827_s28 }
 0x156   : > { %s3752_s13 = scalar_lea.vmem [#allocation11], %s2442_s10 }
 0x157   : > { %3186 = dma.done.wait (%p4103_p10), %s861_s25, 32  }
 0x158   : > { %3188 = vsyncadd (%p4103_p10), %s861_s25, 4294967264  ;;  %s877_s2 = scalar_lea.sflag [#allocation16], %s827_s28 }
 0x159   : > { %3190 = dma.done.wait (%p4103_p10), %s877_s2, 272  }
 0x15a   : > { %3192 = vsyncadd (%p4103_p10), %s877_s2, 4294967024  ;;  %s3765_s27 = scalar_lea.vmem [#allocation17], %s2442_s10  ;;  %s894_s26 = scalar_lea.sflag [#allocation19], %s3738_s5 }
 0x15b   : > { %3194 = dma.done.wait (%p4103_p10), %s894_s26, 16  }
 0x15c   : > { %3196 = vsyncadd (%p4103_p10), %s894_s26, 4294967280  ;;  %p1009_p0 = scmp.lt.s32.totalorder %s3215_s21, 1  ;;  %s4104_s15 = sld [smem:[#allocation34_spill]] }
 0x15d   : > { %s4105_s18 = sld [smem:[#allocation36_spill]]  ;;  %s4106_s19 = sld [smem:[#allocation38_spill]] }
 0x15e   : > { %s3775_s0 = scalar_select %p1009_p0, %s3215_s21, 1 }
 0x15f   : > { %s4107_s20 = sld [smem:[#allocation46_spill]]  ;;  %s4108_s9 = sld [smem:[#allocation47_spill]] }
 0x160   : > { %s2502_s29 = sshll.u32 %s3775_s0, 4  ;;  %s2505_s14 = sshll.u32 %s3775_s0, 5 }
 0x161   : > { %p2452_p6 = scmp.ne.s32.totalorder %s3215_s21, 0 }
 0x162   : > { %s1013_s10 = scalar_lea.vmem %s4104_s15, %s2502_s29  ;;  %s4109_s15 = sld [smem:[#allocation48_spill]]  ;;  %v1043_v0 = vld [vmem:[#allocation3] sm:$0xff] (!%p2452_p6)  ;;  %vm1045_vm0 = vcmask (!%p2452_p6), 261120   ;;  %v1044_v1 = vld [vmem:[#allocation3 + $0x8] sm:$0xff] (!%p2452_p6) }
 0x163   : > { %s1018_s26 = scalar_lea.vmem %s4105_s18, %s2502_s29  ;;  %s3788_s23 = scalar_lea.vmem %s4106_s19, %s2502_s29  ;;  %1046 = vst.msk [vmem:[#allocation2] sm:$0xff] (!%p2452_p6), %vm1045_vm0, %v1043_v0  ;;  %1047 = vst.msk [vmem:[#allocation2 + $0x8] sm:$0xff] (!%p2452_p6), %vm1045_vm0, %v1044_v1 }
 0x164   : > { %s4110_s18 = sld [smem:[#allocation49_spill]]  ;;  %1042 = sbr.rel (%p2452_p6) target bundleno = 363 (0x16b), region = 140 }
 0x165   : > { %s3793_s4 = scalar_lea.vmem %s4107_s20, %s2505_s14  ;;  %s1031_s11 = scalar_lea.vmem %s4108_s9, %s3775_s0 }
 0x168   : > { %s1034_s12 = scalar_lea.vmem %s4109_s15, %s3775_s0 }
 0x16a   : > { %s1037_s1 = scalar_lea.vmem %s4110_s18, %s3775_s0 }
 0x16b PF: > { %v2781_v2 = vld [vmem:[%s1018_s26] sm:$0xff]   ;;  %v3239_v3 = vmov 0.0   ;;  %v2783_v5 = vld [vmem:[%s1018_s26 + $0x8] sm:$0xff]   ;;  %vm3240_vm1 = vmmov 0   ;;  %vm1074_vm2 = vcmask 261120   ;;  %s4111_s7 = scalar_lea.vmem [#allocation8], %s3738_s5 }
 0x16c   : > { %2553 = vmatprep.subr.bf16.mxu1 %v3239_v3  ;;  %2545 = vmatprep.subr.bf16.mxu0 %v3239_v3  ;;  %v2782_v4 = vld [vmem:[%s1013_s10] sm:$0xff]   ;;  %v3815_v7 = vld [vmem:[#allocation2 + $0x8] sm:$0xff]  ;;  %s4112_s8 = scalar_lea.vmem [#allocation6], %s3738_s5  ;;  %vm1273_vm3 = vcmask 130048   ;;  %s3241_s9 = smov 112   ;;  %vm1502_vm4 = vcmask 1043456  }
 0x16d   : > { %2554 = vmatpush3.bf16.msra.mxu1 %v2781_v2  ;;  %2557 = vmatprep.mubr.msk.bf16.mxu1 %vm3240_vm1, %v3239_v3  ;;  %v3813_v6 = vld [vmem:[#allocation2] sm:$0xff]  ;;  %v2784_v8 = vld [vmem:[%s1013_s10 + $0x8] sm:$0xff]   ;;  %s4113_s24 = scalar_lea.vmem [#allocation9], %s3738_s5  ;;  %vm1458_vm5 = vcmask 64512   ;;  %s3242_s20 = smov 16   ;;  %vm1927_vm6 = vcmask 523264  }
 0x16e   : > { %2555 = vmatprep.subr.bf16.mxu1 %v3239_v3  ;;  %2546 = vmatpush3.bf16.msra.mxu0 %v2782_v4  ;;  %v1050_v9 = vpack.c.bf16 %v3815_v7, %v3813_v6  ;;  %v2785_v10 = vld [vmem:[%s3788_s23] sm:$0xff]   ;;  %v2786_v11 = vld [vmem:[%s3788_s23 + $0x8] sm:$0xff]   ;;  %s4114_s22 = scalar_lea.vmem [#allocation12], %s3738_s5  ;;  %s4116_s23 = scalar_lea.vmem [#allocation15], %s3738_s5 }
 0x16f   : > { %2547 = vmatprep.subr.bf16.mxu0 %v3239_v3  ;;  %2549 = vmatprep.mubr.msk.bf16.mxu0 %vm3240_vm1, %v3239_v3  ;;  %v2457_v12 = vld [vmem:[%s4111_s7] ss:$0 sm:$0xff]  ;;  %s4117_s19 = scalar_lea.vmem [#allocation18], %s3738_s5  ;;  %p2491_p11 = scmp.ne.s32.totalorder %s3215_s21, 1 }
 0x170   : > { %v2453_v13 = vld [vmem:[%s4112_s8] ss:$0 sm:$0xff]  ;;  %s4121_s28 = sld [smem:[#allocation50_spill]] (!%p2491_p11)  ;;  %vm3244_vm7 = vmmov (!%p2491_p11), 0   ;;  %vm2042_vm8 = vcmask (!%p2491_p11), 1041409   ;;  %s4122_s15 = sld [smem:[#allocation51_spill]] (!%p2491_p11) }
 0x171   : > { %2556 = vmatpush3.bf16.msra.mxu1 %v2783_v5  ;;  %v2461_v34 = vld [vmem:[%s4113_s24] ss:$0 sm:$0xff]  ;;  %vm2100_vm9 = vcmask (!%p2491_p11), 1041408  }
 0x172   : > { %2548 = vmatpush3.bf16.msra.mxu0 %v2784_v8  ;;  %2569 = vmatprep.subr.bf16.mxu1 %v3239_v3 }
 0x173   : > { %2561 = vmatprep.subr.bf16.mxu0 %v3239_v3 }
 0x174   : > { %2558 = vmatmul.mubr.msk.bf16.vlgmr.msra.gmra.mrb[0].mxu1 %vm1074_vm2, %v1050_v9 }
 0x175   : > { %2550 = vmatmul.mubr.msk.bf16.vlgmr.msra.gmra.mrb[0].mxu0 %vm1074_vm2, %v1050_v9  ;;  %2571 = vmatprep.mubr.msk.bf16.mxu1 %vm3240_vm1, %v3239_v3 }
 0x176   : > { %2565 = vmatprep.mubr.msk.bf16.mxu0 %vm3240_vm1, %v3239_v3  ;;  %2562 = vmatpush3.bf16.msra.mxu0 %v2785_v10 }
 0x177   : > { %2563 = vmatprep.subr.bf16.mxu0 %v3239_v3 }
 0x17a   : > { %2564 = vmatpush3.bf16.msra.mxu0 %v2786_v11 }
 0x17b   : > { %2575 = vmatprep.subr.bf16.mxu0 %v3239_v3 }
 0x17d   : > { %2566 = vmatmul.mubr.msk.bf16.vlgmr.msra.gmra.mrb[4].mxu0 %vm1074_vm2, %v1050_v9 }
 0x17e   : > { %2577 = vmatprep.mubr.msk.bf16.mxu0 %vm3240_vm1, %v3239_v3 }
 0x247   : > { %v1176_v14 = vpop.f32.mrb[0].mxu1 }
 0x248   : > { %v1177_v15 = vadd.f32 %v2457_v12, %v1176_v14  ;;  %v2559_v16 = vpop.f32.mrb[1].mxu1  ;;  %v1112_v17 = vpop.f32.mrb[0].mxu0 }
 0x249   : > { %v1179_v18 = vpop.f32.mrb[2].mxu1  ;;  %v1113_v19 = vadd.f32 %v2453_v13, %v1112_v17  ;;  %v2551_v20 = vpop.f32.mrb[1].mxu0 }
 0x24a   : > { %v1251_v21 = vpack.c.bf16 %v1177_v15, %v1177_v15  ;;  %v1180_v22 = vadd.f32 %v2457_v12, %v1179_v18  ;;  %v2560_v23 = vpop.f32.mrb[3].mxu1  ;;  %v1115_v24 = vpop.f32.mrb[2].mxu0 }
 0x24b   : > { %v1247_v25 = vmul.f32 0.25, %v1113_v19  ;;  %v1116_v26 = vadd.f32 %v2453_v13, %v1115_v24  ;;  %v2552_v27 = vpop.f32.mrb[3].mxu0 }
 0x24c   : > { %v1278_v28 = vsel %vm1273_vm3, %v1251_v21, 0  ;;  %v1252_v29 = vpack.c.bf16 %v1180_v22, %v1180_v22  ;;  %1263 = vrot.lane.b32.xlu0 %v1251_v21, %s3241_s9 }
 0x24d   : > { %v1249_v30 = vpack.c.bf16 %v1247_v25, %v1247_v25  ;;  %v1248_v31 = vmul.f32 0.25, %v1116_v26  ;;  %2570 = vmatpush3.bf16.xpose.msra.mxu1 %v1278_v28 }
 0x24e   : > { %1265 = vrot.lane.b32.xlu1 %v1252_v29, %s3241_s9  ;;  %2581 = vmatprep.subr.bf16.mxu1 %v3239_v3  ;;  %v1370_v33 = vsel %vm1273_vm3, %v1252_v29, 0 }
 0x24f   : > { %v1250_v32 = vpack.c.bf16 %v1248_v31, %v1248_v31 }
 0x250   : > { %1257 = vrot.lane.b32.xlu0 %v1249_v30, %s3241_s9  ;;  %v1240_v35 = vpop.f32.mrb[4].mxu0 }
 0x251   : > { %v1241_v36 = vadd.f32 %v2461_v34, %v1240_v35  ;;  %v2567_v37 = vpop.f32.mrb[5].mxu0 }
 0x252   : > { %1259 = vrot.lane.b32.xlu1 %v1250_v32, %s3241_s9  ;;  %v1243_v38 = vpop.f32.mrb[6].mxu0 }
 0x253   : > { %v1253_v39 = vpack.c.bf16 %v1241_v36, %v1241_v36  ;;  %v1244_v40 = vadd.f32 %v2461_v34, %v1243_v38  ;;  %v2568_v41 = vpop.f32.mrb[7].mxu0  ;;  %v2787_v38 = vld [vmem:[%s3752_s13] sm:$0xff]  }
 0x254   : > { %2572 = vmatmul.mubr.msk.bf16.vlgmr.msra.gmra.mrb[4].mxu1 %vm1273_vm3, %v1249_v30 }
 0x255   : > { %2582 = vmatpush3.bf16.xpose.msra.mxu1 %v1370_v33  ;;  %2583 = vmatprep.mubr.msk.bf16.mxu1 %vm3240_vm1, %v3239_v3  ;;  %v1504_v42 = vsel %vm1502_vm4, %v1253_v39, 0  ;;  %v1254_v4 = vpack.c.bf16 %v1244_v40, %v1244_v40 }
 0x256   : > { %2593 = vmatprep.subr.bf16.mxu1 %v3239_v3 }
 0x257   : > { %v1596_v34 = vsel %vm1502_vm4, %v1254_v4, 0 }
 0x25c   : > { %2584 = vmatmul.mubr.msk.bf16.vlgmr.msra.gmra.mrb[8].mxu1 %vm1273_vm3, %v1250_v32 }
 0x25d   : > { %2595 = vmatprep.mubr.msk.bf16.mxu1 %vm3240_vm1, %v3239_v3  ;;  %2594 = vmatpush3.bf16.msra.mxu1 %v1504_v42 }
 0x25e   : > { %2605 = vmatprep.subr.bf16.mxu1 %v3239_v3 }
 0x2be   : > { %v1264_v43 = vpop.permute.xlu0 %1263 }
 0x2bf   : > { %v1324_v44 = vsel %vm1273_vm3, %v1264_v43, 0  ;;  %v2788_v43 = vld [vmem:[%s3752_s13 + $0x8] sm:$0xff]   ;;  %s4115_s13 = scalar_lea.vmem [#allocation14], %s3738_s5 }
 0x2c0   : > { %2576 = vmatpush3.bf16.xpose.msra.mxu0 %v1324_v44  ;;  %v1266_v45 = vpop.permute.xlu1 %1265 }
 0x2c1   : > { %2587 = vmatprep.subr.bf16.mxu0 %v3239_v3  ;;  %v1416_v47 = vsel %vm1273_vm3, %v1266_v45, 0 }
 0x2c2   : > { %v1258_v46 = vpop.permute.xlu0 %1257 }
 0x2c4   : > { %v1260_v48 = vpop.permute.xlu1 %1259 }
 0x2c7   : > { %2578 = vmatmul.mubr.msk.bf16.vlgmr.msra.gmra.mrb[8].mxu0 %vm1273_vm3, %v1258_v46 }
 0x2c8   : > { %2588 = vmatpush3.bf16.xpose.msra.mxu0 %v1416_v47  ;;  %2589 = vmatprep.mubr.msk.bf16.mxu0 %vm3240_vm1, %v3239_v3 }
 0x2c9   : > { %2599 = vmatprep.subr.bf16.mxu0 %v3239_v3 }
 0x2cf   : > { %2590 = vmatmul.mubr.msk.bf16.vlgmr.msra.gmra.mrb[12].mxu0 %vm1273_vm3, %v1260_v48 }
 0x2d0   : > { %2601 = vmatprep.mubr.msk.bf16.mxu0 %vm3240_vm1, %v3239_v3 }
 0x327   : > { %v1314_v49 = vpop.f32.mrb[4].mxu1 }
 0x328   : > { %v2573_v50 = vpop.f32.mrb[5].mxu1  ;;  %v1459_v5 = vsel %vm1458_vm5, %v1314_v49, -inf }
 0x329   : > { %v1317_v51 = vpop.f32.mrb[6].mxu1 }
 0x32a   : > { %v2574_v52 = vpop.f32.mrb[7].mxu1 }
 0x32f   : > { %v1406_v53 = vpop.f32.mrb[8].mxu1 }
 0x330   : > { %v2585_v54 = vpop.f32.mrb[9].mxu1  ;;  %v1465_v8 = vsel %vm1458_vm5, %v1406_v53, -inf }
 0x331   : > { %v1409_v55 = vpop.f32.mrb[10].mxu1 }
 0x332   : > { %v2586_v56 = vpop.f32.mrb[11].mxu1 }
 0x39a   : > { %v1360_v57 = vpop.f32.mrb[8].mxu0 }
 0x39b   : > { %v2579_v58 = vpop.f32.mrb[9].mxu0  ;;  %v1462_v59 = vsel %vm1458_vm5, %v1360_v57, -inf }
 0x39c   : > { %1463 = vmax.xlane.f32.xlu0 %v1462_v59  ;;  %v1363_v60 = vpop.f32.mrb[10].mxu0 }
 0x39d   : > { %v2580_v61 = vpop.f32.mrb[11].mxu0 }
 0x3a2   : > { %v1452_v62 = vpop.f32.mrb[12].mxu0 }
 0x3a3   : > { %v2591_v63 = vpop.f32.mrb[13].mxu0  ;;  %v1468_v0 = vsel %vm1458_vm5, %v1452_v62, -inf }
 0x3a4   : > { %1469 = vmax.xlane.f32.xlu1 %v1468_v0  ;;  %v1455_v1 = vpop.f32.mrb[14].mxu0 }
 0x3a5   : > { %v2592_v2 = vpop.f32.mrb[15].mxu0 }
 0x3b2   : > { %1269 = vrot.lane.b32.xlu0 %v1253_v39, %s3241_s9 }
 0x3b5   : > { %1271 = vrot.lane.b32.xlu1 %v1254_v4, %s3241_s9 }
 0x3d1   : > { %1460 = vmax.xlane.f32.xlu0 %v1459_v5 }
 0x3d9   : > { %1466 = vmax.xlane.f32.xlu1 %v1465_v8 }
 0x429   : > { %v1464_v9 = vpop.xlane.xlu0 %1463 }
 0x42a   : > { %v1472_v10 = vsub.f32 %v1360_v57, %v1464_v9 }
 0x42c   : > { %v1477_v11 = vmul.f32 1.442695, %v1472_v10 }
 0x42d   : > { %v1270_v12 = vpop.permute.xlu0 %1269 }
 0x42e   : > { %2795 = vpow2.f32 %v1477_v11  ;;  %v1550_v13 = vsel %vm1502_vm4, %v1270_v12, 0 }
 0x42f   : > { %2600 = vmatpush3.bf16.msra.mxu0 %v1550_v13 }
 0x430   : > { %2611 = vmatprep.subr.bf16.mxu0 %v3239_v3 }
 0x431   : > { %v1470_v14 = vpop.xlane.xlu1 %1469 }
 0x432   : > { %v1474_v15 = vsub.f32 %v1452_v62, %v1470_v14  ;;  %v2473_v14 = vld [vmem:[%s4114_s22] ss:$0 sm:$0xff] }
 0x434   : > { %v1481_v16 = vmul.f32 1.442695, %v1474_v15 }
 0x435   : > { %v1272_v18 = vpop.permute.xlu1 %1271 }
 0x436   : > { %2797 = vpow2.f32 %v1481_v16  ;;  %v1642_v21 = vsel %vm1502_vm4, %v1272_v18, 0 }
 0x438   : > { %v2796_v17 = vpop.eup %2795 }
 0x439   : > { %v1486_v19 = vsel %vm1458_vm5, %v2796_v17, 0.0  ;;  %v1496_v20 = vpack.c.bf16 %v2796_v17, %v2796_v17 }
 0x43a   : > { %1487 = vadd.xlane.f32.xlu0 %v1486_v19 }
 0x43b   : > { %2602 = vmatmul.mubr.msk.bf16.vlgmr.msra.gmra.mrb[16].mxu0 %vm1458_vm5, %v1496_v20 }
 0x43c   : > { %2612 = vmatpush3.bf16.msra.mxu0 %v1642_v21  ;;  %2613 = vmatprep.mubr.msk.bf16.mxu0 %vm3240_vm1, %v3239_v3 }
 0x43d   : > { %2625 = vmatprep.subr.bf16.mxu0 %v3239_v3 }
 0x440   : > { %v2798_v22 = vpop.eup %2797 }
 0x441   : > { %v1492_v23 = vsel %vm1458_vm5, %v2798_v22, 0.0  ;;  %v1498_v24 = vpack.c.bf16 %v2798_v22, %v2798_v22 }
 0x442   : > { %1493 = vadd.xlane.f32.xlu0 %v1492_v23 }
 0x443   : > { %2614 = vmatmul.mubr.msk.bf16.vlgmr.msra.gmra.mrb[20].mxu0 %vm1458_vm5, %v1498_v24 }
 0x444   : > { %2629 = vmatprep.mubr.msk.bf16.mxu0 %vm3240_vm1, %v3239_v3 }
 0x45e   : > { %v1461_v25 = vpop.xlane.xlu0 %1460 }
 0x45f   : > { %v1471_v26 = vsub.f32 %v1314_v49, %v1461_v25 }
 0x461   : > { %v1475_v27 = vmul.f32 1.442695, %v1471_v26 }
 0x463   : > { %2799 = vpow2.f32 %v1475_v27 }
 0x466   : > { %v1467_v28 = vpop.xlane.xlu1 %1466 }
 0x467   : > { %v1473_v29 = vsub.f32 %v1406_v53, %v1467_v28 }
 0x469   : > { %v1479_v30 = vmul.f32 1.442695, %v1473_v29 }
 0x46b   : > { %2801 = vpow2.f32 %v1479_v30 }
 0x46d   : > { %v2800_v31 = vpop.eup %2799 }
 0x46e   : > { %v1483_v32 = vsel %vm1458_vm5, %v2800_v31, 0.0  ;;  %v1495_v33 = vpack.c.bf16 %v2800_v31, %v2800_v31 }
 0x46f   : > { %1484 = vadd.xlane.f32.xlu1 %v1483_v32 }
 0x470   : > { %2596 = vmatmul.mubr.msk.bf16.vlgmr.msra.gmra.mrb[12].mxu1 %vm1458_vm5, %v1495_v33  ;;  %v2789_v33 = vld [vmem:[%s3765_s27] sm:$0xff]  }
 0x471   : > { %2606 = vmatpush3.bf16.msra.mxu1 %v1596_v34  ;;  %2607 = vmatprep.mubr.msk.bf16.mxu1 %vm3240_vm1, %v3239_v3  ;;  %v2790_v34 = vld [vmem:[%s3765_s27 + $0x8] sm:$0xff]  }
 0x472   : > { %2617 = vmatprep.subr.bf16.mxu1 %v3239_v3  ;;  %2626 = vmatpush3.bf16.msra.mxu0 %v2789_v33 }
 0x473   : > { %2627 = vmatprep.subr.bf16.mxu0 %v3239_v3 }
 0x475   : > { %v2802_v35 = vpop.eup %2801 }
 0x476   : > { %v1489_v36 = vsel %vm1458_vm5, %v2802_v35, 0.0  ;;  %v1497_v37 = vpack.c.bf16 %v2802_v35, %v2802_v35  ;;  %2628 = vmatpush3.bf16.msra.mxu0 %v2790_v34  ;;  %v2791_v35 = vld [vmem:[%s3793_s4] sm:$0xff]  }
 0x477   : > { %1490 = vadd.xlane.f32.xlu0 %v1489_v36  ;;  %v2792_v36 = vld [vmem:[%s3793_s4 + $0x8] sm:$0xff]  }
 0x478   : > { %2608 = vmatmul.mubr.msk.bf16.vlgmr.msra.gmra.mrb[16].mxu1 %vm1458_vm5, %v1497_v37 }
 0x479   : > { %2621 = vmatprep.mubr.msk.bf16.mxu1 %vm3240_vm1, %v3239_v3  ;;  %2618 = vmatpush3.bf16.msra.mxu1 %v2787_v38 }
 0x47a   : > { %2619 = vmatprep.subr.bf16.mxu1 %v3239_v3 }
 0x47d   : > { %2620 = vmatpush3.bf16.msra.mxu1 %v2788_v43 }
 0x47e   : > { %2633 = vmatprep.subr.bf16.mxu1 %v3239_v3 }
 0x4c7   : > { %v1488_v39 = vpop.xlane.xlu0 %1487 }
 0x4c8   : > { %2803 = vrcp.f32 %v1488_v39 }
 0x4cf   : > { %v1494_v40 = vpop.xlane.xlu0 %1493 }
 0x4d0   : > { %2805 = vrcp.f32 %v1494_v40 }
 0x4d2   : > { %v2804_v46 = vpop.eup %2803 }
 0x4da   : > { %v2806_v47 = vpop.eup %2805 }
 0x4fc   : > { %v1485_v63 = vpop.xlane.xlu1 %1484 }
 0x4fd   : > { %2807 = vrcp.f32 %v1485_v63 }
 0x504   : > { %v1491_v0 = vpop.xlane.xlu0 %1490 }
 0x505   : > { %2809 = vrcp.f32 %v1491_v0 }
 0x507   : > { %v2808_v1 = vpop.eup %2807 }
 0x50e   : > { %v1586_v41 = vpop.f32.mrb[16].mxu0 }
 0x50f   : > { %v2603_v42 = vpop.f32.mrb[17].mxu0  ;;  %v1689_v49 = vmul.f32 %v2804_v46, %v1586_v41  ;;  %v2810_v2 = vpop.eup %2809 }
 0x510   : > { %v1589_v44 = vpop.f32.mrb[18].mxu0 }
 0x511   : > { %v2604_v45 = vpop.f32.mrb[19].mxu0 }
 0x512   : > { %v2477_v45 = vld [vmem:[%s4115_s13] ss:$0 sm:$0xff] }
 0x516   : > { %v1678_v48 = vpop.f32.mrb[20].mxu0 }
 0x517   : > { %v1691_v50 = vmul.f32 %v2806_v47, %v1678_v48  ;;  %v2615_v51 = vpop.f32.mrb[21].mxu0 }
 0x518   : > { %v1681_v52 = vpop.f32.mrb[22].mxu0 }
 0x519   : > { %v2776_v53 = vpack.i.bf16 %v1691_v50, %v1689_v49  ;;  %v2616_v54 = vpop.f32.mrb[23].mxu0  ;;  %v2478_v49 = vld [vmem:[%s4116_s23] ss:$0 sm:$0xff] }
 0x51a   : > { %v2793_v54 = vld [vmem:[%s3793_s4 + $0x10] sm:$0xff]  }
 0x51b   : > { %2777 = vrot.lane.b32.xlu1 %v2776_v53, %s3242_s20 }
 0x543   : > { %v1540_v55 = vpop.f32.mrb[12].mxu1 }
 0x544   : > { %v2597_v56 = vpop.f32.mrb[13].mxu1  ;;  %v1688_v5 = vmul.f32 %v2808_v1, %v1540_v55  ;;  %v2794_v55 = vld [vmem:[%s3793_s4 + $0x18] sm:$0xff]  }
 0x545   : > { %v1543_v57 = vpop.f32.mrb[14].mxu1  ;;  %v2479_v56 = vld [vmem:[%s4117_s19] ss:$0 sm:$0xff] }
 0x546   : > { %v2598_v58 = vpop.f32.mrb[15].mxu1 }
 0x54b   : > { %v1632_v59 = vpop.f32.mrb[16].mxu1 }
 0x54c   : > { %v2609_v60 = vpop.f32.mrb[17].mxu1  ;;  %v1690_v8 = vmul.f32 %v2810_v2, %v1632_v59 }
 0x54d   : > { %v1635_v61 = vpop.f32.mrb[18].mxu1 }
 0x54e   : > { %v2610_v62 = vpop.f32.mrb[19].mxu1 }
 0x58d   : > { %v2778_v4 = vpop.permute.xlu1 %2777 }
 0x58e   : > { %v2780_v9 = vunpack.i.h.bf16 %v2778_v4  ;;  %v2779_v10 = vunpack.i.l.bf16 %v2778_v4 }
 0x590   : > { %v1701_v11 = vsel %vm1273_vm3, %v1690_v8, %v2780_v9  ;;  %v1700_v12 = vsel %vm1273_vm3, %v1688_v5, %v2779_v10 }
 0x591   : > { %v1702_v13 = vpack.c.bf16 %v1701_v11, %v1700_v12 }
 0x593   : > { %2622 = vmatmul.mubr.msk.bf16.vlgmr.msra.gmra.mrb[20].mxu1 %vm1074_vm2, %v1702_v13 }
 0x594   : > { %2641 = vmatprep.mubr.msk.bf16.mxu1 %vm3240_vm1, %v3239_v3  ;;  %2634 = vmatpush3.bf16.msra.mxu1 %v2791_v35 }
 0x595   : > { %2635 = vmatprep.subr.bf16.mxu1 %v3239_v3 }
 0x598   : > { %2636 = vmatpush3.bf16.msra.mxu1 %v2792_v36 }
 0x599   : > { %2637 = vmatprep.subr.bf16.mxu1 %v3239_v3 }
 0x59c   : > { %2638 = vmatpush3.bf16.msra.mxu1 %v2793_v54 }
 0x59d   : > { %2639 = vmatprep.subr.bf16.mxu1 %v3239_v3  ;;  %v2483_v3 = vld [vmem:[%s1031_s11] ss:$0 sm:$0xff] }
 0x5a0   : > { %2640 = vmatpush3.bf16.msra.mxu1 %v2794_v55 }
 0x666   : > { %v1763_v15 = vpop.f32.mrb[20].mxu1 }
 0x667   : > { %v1764_v16 = vadd.f32 %v2473_v14, %v1763_v15  ;;  %v2623_v17 = vpop.f32.mrb[21].mxu1 }
 0x668   : > { %v1766_v18 = vpop.f32.mrb[22].mxu1 }
 0x669   : > { %v1767_v19 = vadd.f32 %v2473_v14, %v1766_v18  ;;  %v2624_v20 = vpop.f32.mrb[23].mxu1  ;;  %v1770_v21 = vadd.f32 %v1764_v16, %v3813_v6 }
 0x66b   : > { %v1774_v22 = vsel %vm1074_vm2, %v1770_v21, 0.0  ;;  %v1771_v23 = vadd.f32 %v1767_v19, %v3815_v7 }
 0x66c   : > { %1775 = vadd.xlane.f32.xlu0 %v1774_v22 }
 0x66d   : > { %v1777_v24 = vsel %vm1074_vm2, %v1771_v23, 0.0 }
 0x670   : > { %1778 = vadd.xlane.f32.xlu0 %v1777_v24 }
 0x6f9   : > { %v1776_v25 = vpop.xlane.xlu0 %1775 }
 0x6fa   : > { %v1781_v26 = vmul.f32 0.03125, %v1776_v25 }
 0x6fc   : > { %v1783_v27 = vsub.f32 %v1770_v21, %v1781_v26 }
 0x6fd   : > { %v1779_v28 = vpop.xlane.xlu0 %1778 }
 0x6fe   : > { %v1782_v29 = vmul.f32 0.03125, %v1779_v28  ;;  %v1785_v30 = vmul.f32 %v1783_v27, %v1783_v27 }
 0x700   : > { %v1784_v31 = vsub.f32 %v1771_v23, %v1782_v29  ;;  %v1787_v6 = vsel %vm1074_vm2, %v1785_v30, 0.0 }
 0x701   : > { %1788 = vadd.xlane.f32.xlu0 %v1787_v6  ;;  %v2489_v6 = vld [vmem:[%s1034_s12] ss:$0 sm:$0xff] }
 0x702   : > { %v1786_v32 = vmul.f32 %v1784_v31, %v1784_v31 }
 0x704   : > { %v1790_v7 = vsel %vm1074_vm2, %v1786_v32, 0.0 }
 0x705   : > { %1791 = vadd.xlane.f32.xlu0 %v1790_v7  ;;  %v2490_v7 = vld [vmem:[%s1037_s1] ss:$0 sm:$0xff] }
 0x78e   : > { %v1789_v37 = vpop.xlane.xlu0 %1788 }
 0x78f   : > { %v1793_v38 = vmul.f32 0.03125, %v1789_v37 }
 0x791   : > { %v1795_v39 = vadd.f32 1e-05, %v1793_v38 }
 0x792   : > { %v1792_v40 = vpop.xlane.xlu0 %1791 }
 0x793   : > { %2811 = vrsqrt.f32 %v1795_v39  ;;  %v1794_v41 = vmul.f32 0.03125, %v1792_v40  ;;  %v2819_v39 = vld [vmem:[%s4121_s28] sm:$0xff] (!%p2491_p11)  }
 0x795   : > { %v1796_v42 = vadd.f32 1e-05, %v1794_v41 }
 0x797   : > { %2813 = vrsqrt.f32 %v1796_v42  ;;  %v3243_v42 = vmov (!%p2491_p11), 0.0  }
 0x798   : > { %2645 = vmatprep.subr.bf16.mxu0 (!%p2491_p11), %v3243_v42 }
 0x79d   : > { %v2812_v43 = vpop.eup %2811 }
 0x79e   : > { %v1799_v44 = vmul.f32 %v2812_v43, %v1783_v27  ;;  %v2820_v43 = vld [vmem:[%s4121_s28 + $0x8] sm:$0xff] (!%p2491_p11)  }
 0x7a0   : > { %v1807_v47 = vmul.f32 %v2477_v45, %v1799_v44 }
 0x7a1   : > { %v2814_v46 = vpop.eup %2813 }
 0x7a2   : > { %v1800_v48 = vmul.f32 %v2814_v46, %v1784_v31  ;;  %v1815_v51 = vadd.f32 %v2478_v49, %v1807_v47 }
 0x7a4   : > { %v1808_v50 = vmul.f32 %v2477_v45, %v1800_v48 }
 0x7a6   : > { %v1816_v52 = vadd.f32 %v2478_v49, %v1808_v50  ;;  %v2492_v49 = vld [vmem:[%s4122_s15] ss:$0 sm:$0xff] (!%p2491_p11) }
 0x7a8   : > { %v1817_v53 = vpack.c.bf16 %v1816_v52, %v1815_v51 }
 0x7aa   : > { %2630 = vmatmul.mubr.msk.bf16.vlgmr.msra.gmra.mrb[24].mxu0 %vm1074_vm2, %v1817_v53 }
 0x7ab   : > { %2646 = vmatpush3.bf16.msra.mxu0 (!%p2491_p11), %v2819_v39  ;;  %2649 = vmatprep.mubr.msk.bf16.mxu0 (!%p2491_p11), %vm3244_vm7, %v3243_v42 }
 0x7ac   : > { %2647 = vmatprep.subr.bf16.mxu0 (!%p2491_p11), %v3243_v42 }
 0x7af   : > { %2648 = vmatpush3.bf16.msra.mxu0 (!%p2491_p11), %v2820_v43 }
 0x87d   : > { %v1878_v57 = vpop.f32.mrb[24].mxu0 }
 0x87e   : > { %v1879_v58 = vadd.f32 %v2479_v56, %v1878_v57  ;;  %v2631_v59 = vpop.f32.mrb[25].mxu0 }
 0x87f   : > { %v1881_v60 = vpop.f32.mrb[26].mxu0 }
 0x880   : > { %v1882_v61 = vadd.f32 %v2479_v56, %v1881_v60  ;;  %v2632_v62 = vpop.f32.mrb[27].mxu0  ;;  %v1885_v63 = vmax.f32 %v1879_v58, 0.0 }
 0x882   : > { %v1886_v0 = vmax.f32 %v1882_v61, 0.0 }
 0x884   : > { %v1887_v1 = vpack.c.bf16 %v1886_v0, %v1885_v63 }
 0x886   : > { %2642 = vmatmul.mubr.msk.bf16.vlgmr.msra.gmra.mrb[24].mxu1 %vm1927_vm6, %v1887_v1 }
 0x959   : > { %v1965_v2 = vpop.f32.mrb[24].mxu1 }
 0x95a   : > { %v1966_v4 = vadd.f32 %v2483_v3, %v1965_v2  ;;  %v2643_v5 = vpop.f32.mrb[25].mxu1 }
 0x95b   : > { %v1968_v8 = vpop.f32.mrb[26].mxu1 }
 0x95c   : > { %v1969_v9 = vadd.f32 %v2483_v3, %v1968_v8  ;;  %v2644_v10 = vpop.f32.mrb[27].mxu1  ;;  %v1972_v11 = vadd.f32 %v1966_v4, %v1815_v51 }
 0x95e   : > { %v1976_v12 = vsel %vm1074_vm2, %v1972_v11, 0.0  ;;  %v1973_v13 = vadd.f32 %v1969_v9, %v1816_v52 }
 0x95f   : > { %1977 = vadd.xlane.f32.xlu1 %v1976_v12 }
 0x960   : > { %v1979_v14 = vsel %vm1074_vm2, %v1973_v13, 0.0 }
 0x961   : > { %1980 = vadd.xlane.f32.xlu0 %v1979_v14 }
 0x9ec   : > { %v1978_v15 = vpop.xlane.xlu1 %1977 }
 0x9ed   : > { %v1982_v16 = vmul.f32 0.03125, %v1978_v15 }
 0x9ee   : > { %v1981_v17 = vpop.xlane.xlu0 %1980 }
 0x9ef   : > { %v1984_v18 = vsub.f32 %v1972_v11, %v1982_v16  ;;  %v1983_v19 = vmul.f32 0.03125, %v1981_v17 }
 0x9f1   : > { %v1985_v20 = vsub.f32 %v1973_v13, %v1983_v19  ;;  %v1986_v21 = vmul.f32 %v1984_v18, %v1984_v18 }
 0x9f3   : > { %v1988_v22 = vsel %vm1074_vm2, %v1986_v21, 0.0  ;;  %v1987_v23 = vmul.f32 %v1985_v20, %v1985_v20 }
 0x9f4   : > { %1989 = vadd.xlane.f32.xlu0 %v1988_v22 }
 0x9f5   : > { %v1991_v24 = vsel %vm1074_vm2, %v1987_v23, 0.0 }
 0x9f8   : > { %1992 = vadd.xlane.f32.xlu0 %v1991_v24 }
 0xa81   : > { %v1990_v25 = vpop.xlane.xlu0 %1989 }
 0xa82   : > { %v1994_v26 = vmul.f32 0.03125, %v1990_v25 }
 0xa84   : > { %v1996_v27 = vadd.f32 1e-05, %v1994_v26 }
 0xa85   : > { %v1993_v28 = vpop.xlane.xlu0 %1992 }
 0xa86   : > { %2815 = vrsqrt.f32 %v1996_v27  ;;  %v1995_v29 = vmul.f32 0.03125, %v1993_v28 }
 0xa88   : > { %v1997_v30 = vadd.f32 1e-05, %v1995_v29 }
 0xa8a   : > { %2817 = vrsqrt.f32 %v1997_v30 }
 0xa90   : > { %v2816_v31 = vpop.eup %2815 }
 0xa91   : > { %v2000_v32 = vmul.f32 %v2816_v31, %v1984_v18 }
 0xa93   : > { %v2008_v33 = vmul.f32 %v2489_v6, %v2000_v32 }
 0xa94   : > { %v2818_v34 = vpop.eup %2817 }
 0xa95   : > { %v2016_v35 = vadd.f32 %v2490_v7, %v2008_v33  ;;  %v2001_v36 = vmul.f32 %v2818_v34, %v1985_v20  ;;  %2023 = sbr.rel (%p2491_p11) target bundleno = 3253 (0xcb5), region = 144 }
 0xa97   : > { %2018 = vst.msk [vmem:[#allocation2] sm:$0xff] %vm1074_vm2, %v2016_v35  ;;  %v2009_v37 = vmul.f32 %v2489_v6, %v2001_v36  ;;  %v2024_v40 = vpack.c.bf16 (!%p2491_p11), %v2016_v35, %v2016_v35 }
 0xa99   : > { %v2017_v38 = vadd.f32 %v2490_v7, %v2009_v37  ;;  %v2039_v44 = vunpack.c.l.b16 (!%p2491_p11), %v2024_v40 }
 0xa9b   : > { %2019 = vst.msk [vmem:[#allocation2 + $0x8] sm:$0xff] %vm1074_vm2, %v2017_v38  ;;  %v2025_v41 = vpack.c.bf16 (!%p2491_p11), %v2017_v38, %v2017_v38 }
 0xa9d   : > { %v2040_v45 = vunpack.c.l.b16 %v2025_v41 }
 0xa9f   : > { %v2041_v46 = vrot.slane %v2040_v45, 7 }
 0xaa1   : > { %v2043_v47 = vsel %vm2042_vm8, %v2041_v46, %v2039_v44 }
 0xaa2   : > { %v2044_v48 = vpack.c.b16 %v2043_v47, %v2043_v47 }
 0xaa4   : > { %2650 = vmatmul.mubr.msk.bf16.vlgmr.msra.gmra.mrb[0].mxu0 %vm1074_vm2, %v2044_v48 }
 0xb77   : > { %v2094_v50 = vpop.f32.mrb[0].mxu0 }
 0xb78   : > { %v2095_v51 = vadd.f32 %v2492_v49, %v2094_v50  ;;  %v2651_v52 = vpop.f32.mrb[1].mxu0 }
 0xb79   : > { %v2097_v53 = vpop.f32.mrb[2].mxu0 }
 0xb7a   : > { %v2652_v54 = vpop.f32.mrb[3].mxu0  ;;  %v2101_v55 = vsel %vm2100_vm9, %v2095_v51, -inf }
 0xb7b   : > { %2102 = vmax.xlane.f32.xlu0 %v2101_v55 }
 0xc08   : > { %v2103_v56 = vpop.xlane.xlu0 %2102 }
 0xc09   : > { %v2104_v57 = vsub.f32 %v2095_v51, %v2103_v56 }
 0xc0b   : > { %v2105_v58 = vmul.f32 1.442695, %v2104_v57 }
 0xc0d   : > { %2821 = vpow2.f32 %v2105_v58 }
 0xc17   : > { %v2822_v59 = vpop.eup %2821 }
 0xc18   : > { %v2107_v60 = vsel %vm2100_vm9, %v2822_v59, 0.0 }
 0xc19   : > { %2108 = vadd.xlane.f32.xlu0 %v2107_v60 }
 0xca6   : > { %v2109_v61 = vpop.xlane.xlu0 %2108 }
 0xca7   : > { %2823 = vrcp.f32 %v2109_v61 }
 0xcb1   : > { %v2824_v62 = vpop.eup %2823 }
 0xcb2   : > { %v2111_v63 = vmul.f32 %v2824_v62, %v2822_v59 }
 0xcb4   : > { %2112 = vst [vmem:[#allocation20] sm:$0x3] %v2111_v63 }
 0xcb5 PF: > { %p2714_p12 = scmp.eq.s32.totalorder %s3523_s16, 1  ;;  %s3245_s25 = smov [#allocation20]  }
 0xcb6   : > { %s2122_s2 = sshll.u32 %s3245_s25, 4  ;;  %s2123_s2 = int_to_ptr.vmem [resolvable:$true] %s2122_s2 }
 0xcb7   : > { %s3123_s18 = scalar_lea.vmem %s2123_s2, 32  ;;  %p3130_p7 = scmp.lt.s32.totalorder %s2123_s2, %s2123_s2 }
 0xcb8   : > { %p3124_p13 = scmp.ne.s32.totalorder %s2123_s2, %s3123_s18  ;;  %p3131_p5 = scmp.lt.s32.totalorder %s3123_s18, %s3123_s18 }
 0xcba   : > { %p3125_p8 = pnand %p3124_p13, %p2714_p12  ;;  %p3132_p9 = por %p3131_p5, %p3130_p7 }
 0xcbc   : > { %p3126_p4 = pneg %p3125_p8 }
 0xcbe   : > { %p3133_p1 = pnand %p3132_p9, %p3126_p4 }
 0xcc0   : > { %3136 = shalt.err (!%p3133_p1)
}
 0xcc1   : > { %s4123_s9 = sld [smem:[#allocation52_spill]] }
 0xcc7   : > { %s3137_s24 = scalar_lea.hbm %s4123_s9, 32 }
 0xcc8   : > { %p3138_p3 = scmp.ne.s32.totalorder %s4123_s9, %s3137_s24  ;;  %p3143_p0 = scmp.lt.u32.totalorder %s3137_s24, %s4123_s9 }
 0xcca   : > { %p3139_p2 = pnand %p3138_p3, %p2714_p12 }
 0xccc   : > { %p3140_p10 = pneg %p3139_p2 }
 0xcce   : > { %p3145_p6 = pnand %p3143_p0, %p3140_p10 }
 0xcd0   : > { %3148 = shalt.err (!%p3145_p6)
}
 0xcd1   : > { %2676 = dma.vmem_to_hbm [thread:$0]  (%p2714_p12), %s2123_s2, 32, %s4123_s9, [#allocation5]  }
 0xcd2   : > { %3198 = dma.done.wait (%p2714_p12), [#allocation5], 32  }
 0xcd3   : > { %3200 = vsyncadd (%p2714_p12), [#allocation5], 4294967264 }
 0xcd4 PF: > { %s4124_s27 = sld [smem:[#allocation30_spill]]  ;;  %s4125_s3 = sld [smem:[#allocation28_spill]] }
 0xcd5   : > { %s4126_s20 = sld [smem:[#allocation32_spill]]  ;;  %s4127_s21 = sld [smem:[#allocation29_spill]] }
 0xcd6   : > { %s4128_s1 = sld [smem:[#allocation31_spill]]  ;;  %s4129_s0 = smov %s3207_s30 }
 0xcda   : > { %s46_s22 = sadd.s32 1, %s4124_s27   ;;  %s4130_s30 = smov %s4125_s3 }
 0xcdb   : > { %p43_p11 = scmp.ge.s32.totalorder %s46_s22, 4  }
 0xcdd   :  { %45 = sbr.rel (!%p43_p11) target bundleno = 35 (0x23), region = 265 }
 0xce4   :  { %2135 = vsyncpa [#allocation4], 1 }
 0xce5   :  { %2137 = vsyncpa [#allocation4 + $0x1], 1 }
 0xce6   :  { %2138 = vsyncpa [#allocation7], 1 }
 0xce7   :  { %2140 = vsyncpa [#allocation7 + $0x1], 1 }
 0xce8   :  { %2141 = vsyncpa [#allocation10], 1 }
 0xce9   :  { %2143 = vsyncpa [#allocation10 + $0x1], 1 }
 0xcea   :  { %2144 = vsyncpa [#allocation13], 1 }
 0xceb   :  { %2146 = vsyncpa [#allocation13 + $0x1], 1 }
 0xcec   :  { %2147 = vsyncpa [#allocation16], 1 }
 0xced   :  { %2149 = vsyncpa [#allocation16 + $0x1], 1 }
 0xcee   :  { %2150 = vsyncpa [#allocation19], 1 }
 0xcef   :  { %2152 = vsyncpa [#allocation19 + $0x1], 1 }
 0xcf0   :  { %2153 = vsyncpa [#allocation5], 1 }
 0xcf1   :  { %2155 = vsyncpa [#allocation5 + $0x1], 1 }

</bundles_post_ra>
